<compile_context>
chip_gen: v5e
topology: v5e:2x2
jax: 0.10.0
libtpu: 0.0.40
codegen_flags: <defaults>
</compile_context>

<pallas_src>
import jax
import jax.numpy as jnp
from jax.experimental import pallas as pl
from jax.experimental.pallas import tpu as pltpu

C_IN, C_OUT = 3, 32          # surrogate conv stem channels
H = W = 16                   # spatial size used in the demo
HW = H * W
KH = KW = 3
K_RAW = C_IN * KH * KW       # 27
K_PAD = 32                   # contraction dim padded to an MXU-friendly size
FEATURE_SIZE = 2048          # xception.feature_size
NUM_CLASSES = 2
CLS_PAD = 128                # lane-dense classifier head width
DROP_F = (1.0 - 1.0 / 3.0) * 100.0
DROP_B = (1.0 - 1.0 / 3.0) * 100.0


# ---------------------------------------------------------------------------
# Fused Pallas kernel: conv(im2col matmul) + ReLU + GAP + fc + classifier head
# ---------------------------------------------------------------------------
def _make_fused_kernel(with_muted: bool):
    def kernel(xcol_ref, gap_ref, cw_ref, cb_ref, fw_ref, fb_ref,
               clw_ref, clb_ref, *rest):
        if with_muted:
            mask_ref, f_ref, p_ref, pm_ref = rest
        else:
            f_ref, p_ref = rest
            mask_ref = pm_ref = None

        # conv3x3 (single K=32 im2col matmul) + bias + ReLU   -> (B*HW, C_OUT)
        conv = jnp.dot(xcol_ref[...], cw_ref[...],
                       preferred_element_type=jnp.float32)
        conv = jnp.maximum(conv + cb_ref[...], 0.0)

        # global average pool as an MXU matmul with the (B, B*HW) averaging
        # matrix -> (B, C_OUT); no in-kernel reshapes / cross-lane reductions.
        pooled = jnp.dot(gap_ref[...], conv,
                         preferred_element_type=jnp.float32)

        # fc to feature_size                                   -> (B, 2048)
        feats = jnp.dot(pooled, fw_ref[...],
                        preferred_element_type=jnp.float32) + fb_ref[...]
        f_ref[...] = feats

        # classifier head, lane-padded to 128 columns          -> (B, 128)
        p_ref[...] = jnp.dot(feats, clw_ref[...],
                             preferred_element_type=jnp.float32) + clb_ref[...]

        if with_muted:
            # classifier(all_f * mask_f), fused into the same kernel
            pm_ref[...] = jnp.dot(feats * mask_ref[...], clw_ref[...],
                                  preferred_element_type=jnp.float32) + clb_ref[...]

    return kernel


def _full_block(shape):
    nd = len(shape)
    return pl.BlockSpec(shape, lambda i, _nd=nd: (0,) * _nd)


def _fused_forward(xcol, gap, cw, cb, fw, fb, clw, clb, mask_f=None):
    bn = gap.shape[0]
    with_muted = mask_f is not None
    inputs = [xcol, gap, cw, cb, fw, fb, clw, clb]
    if with_muted:
        inputs.append(mask_f)

    out_shape = [jax.ShapeDtypeStruct((bn, FEATURE_SIZE), jnp.float32),
                 jax.ShapeDtypeStruct((bn, CLS_PAD), jnp.float32)]
    if with_muted:
        out_shape.append(jax.ShapeDtypeStruct((bn, CLS_PAD), jnp.float32))

    return pl.pallas_call(
        _make_fused_kernel(with_muted),
        out_shape=tuple(out_shape),
        grid=(1,),
        in_specs=[_full_block(a.shape) for a in inputs],
        out_specs=[_full_block(s.shape) for s in out_shape],
        compiler_params=pltpu.CompilerParams(
            dimension_semantics=("arbitrary",)),
    )(*inputs)


# ---------------------------------------------------------------------------
# XLA-side input prep (im2col of the NCHW input, GAP averaging matrix)
# ---------------------------------------------------------------------------
def _im2col(x):
    """NCHW -> (B*H*W, K_PAD) patch matrix (zero pad=1, K padded 27 -> 32)."""
    bn = x.shape[0]
    xp = jnp.pad(x, ((0, 0), (0, 0), (1, 1), (1, 1)))
    taps = [xp[:, :, ky:ky + H, kx:kx + W]
            for ky in range(KH) for kx in range(KW)]       # each (B, C, H, W)
    cols = jnp.stack(taps, axis=2)                         # (B, C, 9, H, W)
    cols = cols.transpose(0, 3, 4, 1, 2).reshape(bn * HW, K_RAW)
    return jnp.pad(cols, ((0, 0), (0, K_PAD - K_RAW)))


def _gap_matrix(bn):
    """(B, B*HW) matrix so that gap @ conv == per-sample spatial mean."""
    return jnp.repeat(jnp.eye(bn, dtype=jnp.float32), HW, axis=1) / float(HW)


# ---------------------------------------------------------------------------
# Parameters (PyTorch layouts) + one-time layout prep (hoisted out of forward)
# ---------------------------------------------------------------------------
def init_params(key):
    k1, k2, k3, k4 = jax.random.split(key, 4)
    return {
        "conv_w": jax.random.normal(k1, (C_OUT, C_IN, KH, KW), jnp.float32) * 0.1,
        "conv_b": jnp.zeros((C_OUT,), jnp.float32),
        "fc_w": jax.random.normal(k2, (FEATURE_SIZE, C_OUT), jnp.float32)
                 * (1.0 / jnp.sqrt(float(C_OUT))),
        "fc_b": jnp.zeros((FEATURE_SIZE,), jnp.float32),
        "cls_w": jax.random.normal(k3, (NUM_CLASSES, FEATURE_SIZE), jnp.float32)
                  * (1.0 / jnp.sqrt(float(FEATURE_SIZE))),
        "cls_b": jax.random.normal(k4, (NUM_CLASSES,), jnp.float32) * 0.01,
    }


def prepare_params(params):
    """One-time weight layout prep: im2col conv weights, transposed fc weight,
    lane-padded classifier head.  Done once, not per forward."""
    conv_w_col = params["conv_w"].reshape(C_OUT, K_RAW).T          # (27, C_OUT)
    conv_w_col = jnp.pad(conv_w_col, ((0, K_PAD - K_RAW), (0, 0)))  # (32, C_OUT)
    cls_w_pad = jnp.zeros((FEATURE_SIZE, CLS_PAD), jnp.float32)
    cls_w_pad = cls_w_pad.at[:, :NUM_CLASSES].set(params["cls_w"].T)
    cls_b_pad = jnp.zeros((1, CLS_PAD), jnp.float32)
    cls_b_pad = cls_b_pad.at[0, :NUM_CLASSES].set(params["cls_b"])
    return {
        "conv_w_col": conv_w_col,                    # (K_PAD, C_OUT)
        "conv_b": params["conv_b"][None, :],         # (1, C_OUT)
        "fc_w_t": params["fc_w"].T,                  # (C_OUT, FEATURE_SIZE)
        "fc_b": params["fc_b"][None, :],             # (1, FEATURE_SIZE)
        "cls_w": params["cls_w"],                    # (NUM_CLASSES, FEATURE_SIZE)
        "cls_w_pad": cls_w_pad,                      # (FEATURE_SIZE, CLS_PAD)
        "cls_b_pad": cls_b_pad,                      # (1, CLS_PAD)
    }


# ---------------------------------------------------------------------------
# rsc_model.forward
# ---------------------------------------------------------------------------
def rsc_forward(pp, x, gt=None, mode="test"):
    bn = x.shape[0]
    xcol = _im2col(x)
    gap = _gap_matrix(bn)
    common = (xcol, gap, pp["conv_w_col"], pp["conv_b"],
              pp["fc_w_t"], pp["fc_b"], pp["cls_w_pad"], pp["cls_b_pad"])

    if mode == "train":
        # all_g = autograd.grad((all_p*all_o).sum(), all_f) of a Linear head is
        # analytically one_hot(gt) @ cls_w, so mask_f depends only on (cls_w, gt)
        # and can be computed up-front and fed into the fused kernel.
        all_o = jax.nn.one_hot(gt, NUM_CLASSES, dtype=jnp.float32)       # (B, 2)
        all_g = all_o @ pp["cls_w"]                                      # (B, 2048)
        perc_f = jnp.percentile(all_g, DROP_F, axis=1)                   # (B,)
        mask_f = (all_g < perc_f[:, None]).astype(jnp.float32)

        all_f, p_pad, pm_pad = _fused_forward(*common, mask_f)
        all_p = p_pad[:, :NUM_CLASSES]
        all_p_muted = pm_pad[:, :NUM_CLASSES]

        all_s = jax.nn.softmax(all_p, axis=1)
        all_s_muted = jax.nn.softmax(all_p_muted, axis=1)
        changes = (all_s * all_o).sum(1) - (all_s_muted * all_o).sum(1)
        perc_b = jnp.percentile(changes, DROP_B)
        mask_b = (changes < perc_b)[:, None]                             # (B, 1)
        # classifier(all_f * ((mask_f + mask_b) > 0)) selects, per row,
        # between classifier(all_f) and classifier(all_f * mask_f) exactly:
        # mask_b row -> full all_f -> all_p ; otherwise -> all_p_muted.
        output = jnp.where(mask_b, all_p, all_p_muted)
        return all_f, output

    all_f, p_pad = _fused_forward(*common)
    return all_f, p_pad[:, :NUM_CLASSES]


# ---------------------------------------------------------------------------
# plain-XLA reference (for a numerical sanity check of the fused kernel)
# ---------------------------------------------------------------------------
def _reference_forward(params, x):
    hp = jax.lax.Precision.HIGHEST
    conv = jax.lax.conv_general_dilated(
        x, params["conv_w"], (1, 1), "SAME",
        dimension_numbers=("NCHW", "OIHW", "NCHW"), precision=hp)
    conv = jnp.maximum(conv + params["conv_b"][None, :, None, None], 0.0)
    pooled = conv.mean(axis=(2, 3))
    feats = jnp.dot(pooled, params["fc_w"].T, precision=hp) + params["fc_b"]
    logits = jnp.dot(feats, params["cls_w"].T, precision=hp) + params["cls_b"]
    return feats, logits


if __name__ == "__main__":
    key = jax.random.PRNGKey(0)
    pkey, xkey = jax.random.split(key)
    params = init_params(pkey)
    pp = prepare_params(params)

    x = jax.random.normal(xkey, (2, C_IN, H, W), jnp.float32)   # NCHW like PyTorch
    gt = jnp.array([0, 1], dtype=jnp.int32)

    fwd_test = jax.jit(lambda p_, x_: rsc_forward(p_, x_, mode="test"))
    fwd_train = jax.jit(lambda p_, x_, g_: rsc_forward(p_, x_, g_, mode="train"))

    feats, logits = fwd_test(pp, x)
    feats_tr, logits_tr = fwd_train(pp, x, gt)
    jax.block_until_ready((feats, logits, feats_tr, logits_tr))

    assert feats.shape == (2, FEATURE_SIZE)
    assert logits.shape == (2, NUM_CLASSES)
    assert feats_tr.shape == (2, FEATURE_SIZE)
    assert logits_tr.shape == (2, NUM_CLASSES)

    # sanity: fused Pallas kernel matches the plain-XLA surrogate backbone
    ref_feats, ref_logits = _reference_forward(params, x)
    assert jnp.allclose(feats, ref_feats, rtol=1e-2, atol=1e-2)
    assert jnp.allclose(logits, ref_logits, rtol=1e-2, atol=1e-2)
    # train-mode kernel variant computes identical features
    assert jnp.allclose(feats_tr, feats, rtol=1e-5, atol=1e-5)

    print("KERNEL_OK")
</pallas_src>

<mosaic_0001>
module attributes {stable_mosaic.version = 11 : i64} {
  func.func @kernel(%arg0: i32, %arg1: memref<512x32xf32, #tpu.memory_space<vmem>>, %arg2: memref<2x512xf32, #tpu.memory_space<vmem>>, %arg3: memref<32x32xf32, #tpu.memory_space<vmem>>, %arg4: memref<1x32xf32, #tpu.memory_space<vmem>>, %arg5: memref<32x2048xf32, #tpu.memory_space<vmem>>, %arg6: memref<1x2048xf32, #tpu.memory_space<vmem>>, %arg7: memref<2048x128xf32, #tpu.memory_space<vmem>>, %arg8: memref<1x128xf32, #tpu.memory_space<vmem>>, %arg9: memref<2x2048xf32, #tpu.memory_space<vmem>>, %arg10: memref<2x128xf32, #tpu.memory_space<vmem>>) attributes {dimension_semantics = [#tpu.dimension_semantics<arbitrary>], iteration_bounds = array<i64: 1>, scalar_prefetch = 0 : i64, scratch_operands = 0 : i64, tpu.core_type = #tpu.core_type<tc>, window_params = [{pipeline_mode = #tpu.pipeline_mode<synchronous>, transform_indices = @transform_0, window_bounds = array<i64: 512, 32>}, {pipeline_mode = #tpu.pipeline_mode<synchronous>, transform_indices = @transform_1, window_bounds = array<i64: 2, 512>}, {pipeline_mode = #tpu.pipeline_mode<synchronous>, transform_indices = @transform_2, window_bounds = array<i64: 32, 32>}, {pipeline_mode = #tpu.pipeline_mode<synchronous>, transform_indices = @transform_3, window_bounds = array<i64: 1, 32>}, {pipeline_mode = #tpu.pipeline_mode<synchronous>, transform_indices = @transform_4, window_bounds = array<i64: 32, 2048>}, {pipeline_mode = #tpu.pipeline_mode<synchronous>, transform_indices = @transform_5, window_bounds = array<i64: 1, 2048>}, {pipeline_mode = #tpu.pipeline_mode<synchronous>, transform_indices = @transform_6, window_bounds = array<i64: 2048, 128>}, {pipeline_mode = #tpu.pipeline_mode<synchronous>, transform_indices = @transform_7, window_bounds = array<i64: 1, 128>}, {pipeline_mode = #tpu.pipeline_mode<synchronous>, transform_indices = @transform_8, window_bounds = array<i64: 2, 2048>}, {pipeline_mode = #tpu.pipeline_mode<synchronous>, transform_indices = @transform_9, window_bounds = array<i64: 2, 128>}]} {
    %c0 = arith.constant 0 : index
    %c0_0 = arith.constant 0 : index
    %0 = vector.load %arg1[%c0, %c0_0] : memref<512x32xf32, #tpu.memory_space<vmem>>, vector<512x32xf32>
    %c0_1 = arith.constant 0 : index
    %c0_2 = arith.constant 0 : index
    %1 = vector.load %arg3[%c0_1, %c0_2] : memref<32x32xf32, #tpu.memory_space<vmem>>, vector<32x32xf32>
    %cst = arith.constant dense<0.000000e+00> : vector<512x32xf32>
    %2 = tpu.matmul %0, %1, %cst {dimension_numbers = #tpu.dot_dimension_numbers<[1], [0], [0], [1], [0, 0, 1, 1], [], []>} : vector<512x32xf32>, vector<32x32xf32>, vector<512x32xf32> -> vector<512x32xf32>
    %c0_3 = arith.constant 0 : index
    %c0_4 = arith.constant 0 : index
    %3 = vector.load %arg4[%c0_3, %c0_4] : memref<1x32xf32, #tpu.memory_space<vmem>>, vector<1x32xf32>
    %4 = vector.broadcast %3 : vector<1x32xf32> to vector<512x32xf32>
    %5 = arith.addf %2, %4 : vector<512x32xf32>
    %cst_5 = arith.constant 0.000000e+00 : f32
    %6 = vector.broadcast %cst_5 : f32 to vector<512x32xf32>
    %7 = arith.maximumf %5, %6 : vector<512x32xf32>
    %c0_6 = arith.constant 0 : index
    %c0_7 = arith.constant 0 : index
    %8 = vector.load %arg2[%c0_6, %c0_7] : memref<2x512xf32, #tpu.memory_space<vmem>>, vector<2x512xf32>
    %cst_8 = arith.constant dense<0.000000e+00> : vector<2x32xf32>
    %9 = tpu.matmul %8, %7, %cst_8 {dimension_numbers = #tpu.dot_dimension_numbers<[1], [0], [0], [1], [0, 0, 1, 1], [], []>} : vector<2x512xf32>, vector<512x32xf32>, vector<2x32xf32> -> vector<2x32xf32>
    %c0_9 = arith.constant 0 : index
    %c0_10 = arith.constant 0 : index
    %10 = vector.load %arg5[%c0_9, %c0_10] : memref<32x2048xf32, #tpu.memory_space<vmem>>, vector<32x2048xf32>
    %cst_11 = arith.constant dense<0.000000e+00> : vector<2x2048xf32>
    %11 = tpu.matmul %9, %10, %cst_11 {dimension_numbers = #tpu.dot_dimension_numbers<[1], [0], [0], [1], [0, 0, 1, 1], [], []>} : vector<2x32xf32>, vector<32x2048xf32>, vector<2x2048xf32> -> vector<2x2048xf32>
    %c0_12 = arith.constant 0 : index
    %c0_13 = arith.constant 0 : index
    %12 = vector.load %arg6[%c0_12, %c0_13] : memref<1x2048xf32, #tpu.memory_space<vmem>>, vector<1x2048xf32>
    %13 = vector.broadcast %12 : vector<1x2048xf32> to vector<2x2048xf32>
    %14 = arith.addf %11, %13 : vector<2x2048xf32>
    %c0_14 = arith.constant 0 : index
    %c0_15 = arith.constant 0 : index
    %15 = vector.load %arg9[%c0_14, %c0_15] : memref<2x2048xf32, #tpu.memory_space<vmem>>, vector<2x2048xf32>
    tpu.vector_store %arg9[%c0_14, %c0_15], %14 {strides = array<i32>} : memref<2x2048xf32, #tpu.memory_space<vmem>>, vector<2x2048xf32>,
    %c0_16 = arith.constant 0 : index
    %c0_17 = arith.constant 0 : index
    %16 = vector.load %arg7[%c0_16, %c0_17] : memref<2048x128xf32, #tpu.memory_space<vmem>>, vector<2048x128xf32>
    %cst_18 = arith.constant dense<0.000000e+00> : vector<2x128xf32>
    %17 = tpu.matmul %14, %16, %cst_18 {dimension_numbers = #tpu.dot_dimension_numbers<[1], [0], [0], [1], [0, 0, 1, 1], [], []>} : vector<2x2048xf32>, vector<2048x128xf32>, vector<2x128xf32> -> vector<2x128xf32>
    %c0_19 = arith.constant 0 : index
    %c0_20 = arith.constant 0 : index
    %18 = vector.load %arg8[%c0_19, %c0_20] : memref<1x128xf32, #tpu.memory_space<vmem>>, vector<1x128xf32>
    %19 = vector.broadcast %18 : vector<1x128xf32> to vector<2x128xf32>
    %20 = arith.addf %17, %19 : vector<2x128xf32>
    %c0_21 = arith.constant 0 : index
    %c0_22 = arith.constant 0 : index
    %21 = vector.load %arg10[%c0_21, %c0_22] : memref<2x128xf32, #tpu.memory_space<vmem>>, vector<2x128xf32>
    tpu.vector_store %arg10[%c0_21, %c0_22], %20 {strides = array<i32>} : memref<2x128xf32, #tpu.memory_space<vmem>>, vector<2x128xf32>,
    return
  }
  func.func @transform_0(%arg0: i32) -> (i32, i32) {
    %c0_i32 = arith.constant 0 : i32
    %c0_i32_0 = arith.constant 0 : i32
    %c0_i32_1 = arith.constant 0 : i32
    return %c0_i32, %c0_i32_0 : i32, i32
  }
  func.func @transform_1(%arg0: i32) -> (i32, i32) {
    %c0_i32 = arith.constant 0 : i32
    %c0_i32_0 = arith.constant 0 : i32
    %c0_i32_1 = arith.constant 0 : i32
    return %c0_i32, %c0_i32_0 : i32, i32
  }
  func.func @transform_2(%arg0: i32) -> (i32, i32) {
    %c0_i32 = arith.constant 0 : i32
    %c0_i32_0 = arith.constant 0 : i32
    %c0_i32_1 = arith.constant 0 : i32
    return %c0_i32, %c0_i32_0 : i32, i32
  }
  func.func @transform_3(%arg0: i32) -> (i32, i32) {
    %c0_i32 = arith.constant 0 : i32
    %c0_i32_0 = arith.constant 0 : i32
    %c0_i32_1 = arith.constant 0 : i32
    return %c0_i32, %c0_i32_0 : i32, i32
  }
  func.func @transform_4(%arg0: i32) -> (i32, i32) {
    %c0_i32 = arith.constant 0 : i32
    %c0_i32_0 = arith.constant 0 : i32
    %c0_i32_1 = arith.constant 0 : i32
    return %c0_i32, %c0_i32_0 : i32, i32
  }
  func.func @transform_5(%arg0: i32) -> (i32, i32) {
    %c0_i32 = arith.constant 0 : i32
    %c0_i32_0 = arith.constant 0 : i32
    %c0_i32_1 = arith.constant 0 : i32
    return %c0_i32, %c0_i32_0 : i32, i32
  }
  func.func @transform_6(%arg0: i32) -> (i32, i32) {
    %c0_i32 = arith.constant 0 : i32
    %c0_i32_0 = arith.constant 0 : i32
    %c0_i32_1 = arith.constant 0 : i32
    return %c0_i32, %c0_i32_0 : i32, i32
  }
  func.func @transform_7(%arg0: i32) -> (i32, i32) {
    %c0_i32 = arith.constant 0 : i32
    %c0_i32_0 = arith.constant 0 : i32
    %c0_i32_1 = arith.constant 0 : i32
    return %c0_i32, %c0_i32_0 : i32, i32
  }
  func.func @transform_8(%arg0: i32) -> (i32, i32) {
    %c0_i32 = arith.constant 0 : i32
    %c0_i32_0 = arith.constant 0 : i32
    %c0_i32_1 = arith.constant 0 : i32
    return %c0_i32, %c0_i32_0 : i32, i32
  }
  func.func @transform_9(%arg0: i32) -> (i32, i32) {
    %c0_i32 = arith.constant 0 : i32
    %c0_i32_0 = arith.constant 0 : i32
    %c0_i32_1 = arith.constant 0 : i32
    return %c0_i32, %c0_i32_0 : i32, i32
  }
}

</mosaic_0001>

<bundles_post_ra>
// kernel: _lambda_.1
= control target key start
LH: loop header
LB: loop body
LE: loop exit
PB: predicated region body
PF: predicated region fallthrough
CT: control target
= control target key end

     0   :  { %15 = vsyncpa [#allocation3], 0  ;;  %s3452_s0 = inlined_call_operand.vmem [shape: f32[512,32], index: 0, kind: input, shape index: {}]   ;;  %s3453_s1 = inlined_call_operand.vmem [shape: f32[2,512], index: 1, kind: input, shape index: {}]   ;;  %s3454_s2 = inlined_call_operand.vmem [shape: f32[32,32], index: 2, kind: input, shape index: {}]   ;;  %s3455_s3 = inlined_call_operand.vmem [shape: f32[1,32], index: 3, kind: input, shape index: {}]   ;;  %s3456_s4 = inlined_call_operand.vmem [shape: f32[32,2048], index: 4, kind: input, shape index: {}]   ;;  %s3457_s5 = inlined_call_operand.vmem [shape: f32[1,2048], index: 5, kind: input, shape index: {}]   ;;  %s3458_s6 = inlined_call_operand.vmem [shape: f32[2048,128], index: 6, kind: input, shape index: {}]   ;;  %s3459_s7 = inlined_call_operand.vmem [shape: f32[1,128], index: 7, kind: input, shape index: {}]   ;;  %s3460_s8 = inlined_call_operand.hbm [shape: f32[2,2048], index: 8, kind: output, shape index: {0}]   ;;  %s3461_s9 = inlined_call_operand.hbm [shape: f32[2,128], index: 9, kind: output, shape index: {1}]  }
   0x1   :  { %v100_v0 = vld [vmem:[%s3454_s2 + $0x18] sm:$0xff]  ;;  %v99_v1 = vld [vmem:[%s3454_s2 + $0x10] sm:$0xff]  ;;  %v98_v2 = vld [vmem:[%s3454_s2 + $0x8] sm:$0xff] }
   0x2   :  { %310 = vmatpush.msra.mxu0 %v100_v0  ;;  %1830 = vmatpush.msra.mxu2 %v100_v0 }
   0x3   :  { %1829 = vmatpush.msra.mxu1 %v100_v0 }
   0x4   :  { %311 = vmatpush.msra.mxu0 %v99_v1  ;;  %1832 = vmatpush.msra.mxu2 %v99_v1 }
   0x5   :  { %16 = vsyncpa [#allocation5], 0  ;;  %v97_v3 = vld [vmem:[%s3454_s2] sm:$0xff]  ;;  %1831 = vmatpush.msra.mxu1 %v99_v1  ;;  %vm105_vm0 = vcmask 261120   ;;  %v34_v5 = vld [vmem:[%s3452_s0 + $0x8] sm:$0xff]  ;;  %vm1113_vm1 = vcmask 1041408  }
   0x6   :  { %312 = vmatpush.msra.mxu0 %v98_v2  ;;  %v33_v4 = vld [vmem:[%s3452_s0] sm:$0xff]  ;;  %1834 = vmatpush.msra.mxu2 %v98_v2  ;;  %v35_v6 = vld [vmem:[%s3452_s0 + $0x10] sm:$0xff]  ;;  %v36_v7 = vld [vmem:[%s3452_s0 + $0x18] sm:$0xff]  ;;  %vm1115_vm2 = vcmask 1045508   ;;  %vm1117_vm3 = vcmask 1043456   ;;  %s1893_s26 = smov [#allocation2]  }
   0x7   :  { %1833 = vmatpush.msra.mxu1 %v98_v2  ;;  %v37_v8 = vld [vmem:[%s3452_s0 + $0x20] sm:$0xff]  ;;  %v38_v9 = vld [vmem:[%s3452_s0 + $0x28] sm:$0xff]  ;;  %v39_v10 = vld [vmem:[%s3452_s0 + $0x30] sm:$0xff]  ;;  %s1722_s27 = sshll.u32 %s1893_s26, 4  ;;  %s1724_s30 = sshll.u32 %s3460_s8, 4  ;;  %s1723_s27 = int_to_ptr.vmem [resolvable:$true] %s1722_s27  ;;  %s1725_s30 = int_to_ptr.hbm [resolvable:$true] %s1724_s30 }
   0x8   :  { %313 = vmatpush.msra.mxu0 %v97_v3  ;;  %1836 = vmatpush.msra.mxu2 %v97_v3  ;;  %v84_v11 = vld [vmem:[%s3452_s0 + $0x198] sm:$0xff]  ;;  %v85_v13 = vld [vmem:[%s3452_s0 + $0x1a0] sm:$0xff]  ;;  %v86_v15 = vld [vmem:[%s3452_s0 + $0x1a8] sm:$0xff]  ;;  %s1735_s13 = sshll.u32 %s3461_s9, 4  ;;  %s1736_s13 = int_to_ptr.hbm [resolvable:$true] %s1735_s13 }
   0x9   :  { %1749 = vmatmul.msk.f32.vlgmr.msra.gmra.mxu0 %vm105_vm0, %v33_v4  ;;  %1835 = vmatpush.msra.mxu1 %v97_v3  ;;  %v40_v12 = vld [vmem:[%s3452_s0 + $0x38] sm:$0xff]  ;;  %v41_v14 = vld [vmem:[%s3452_s0 + $0x40] sm:$0xff]  ;;  %v42_v16 = vld [vmem:[%s3452_s0 + $0x48] sm:$0xff] }
   0xa   :  { %1800 = vmatmul.msk.f32.vlgmr.msra.gmra.mxu2 %vm105_vm0, %v84_v11  ;;  %v87_v17 = vld [vmem:[%s3452_s0 + $0x1b0] sm:$0xff]  ;;  %v88_v19 = vld [vmem:[%s3452_s0 + $0x1b8] sm:$0xff]  ;;  %v89_v21 = vld [vmem:[%s3452_s0 + $0x1c0] sm:$0xff] }
   0xb   :  { %v43_v18 = vld [vmem:[%s3452_s0 + $0x50] sm:$0xff]  ;;  %v44_v20 = vld [vmem:[%s3452_s0 + $0x58] sm:$0xff]  ;;  %v45_v22 = vld [vmem:[%s3452_s0 + $0x60] sm:$0xff] }
   0xc   :  { %v90_v23 = vld [vmem:[%s3452_s0 + $0x1c8] sm:$0xff]  ;;  %v91_v25 = vld [vmem:[%s3452_s0 + $0x1d0] sm:$0xff]  ;;  %v92_v27 = vld [vmem:[%s3452_s0 + $0x1d8] sm:$0xff] }
   0xd   :  { %v46_v24 = vld [vmem:[%s3452_s0 + $0x68] sm:$0xff]  ;;  %v47_v26 = vld [vmem:[%s3452_s0 + $0x70] sm:$0xff]  ;;  %v48_v28 = vld [vmem:[%s3452_s0 + $0x78] sm:$0xff] }
   0xe   :  { %v93_v29 = vld [vmem:[%s3452_s0 + $0x1e0] sm:$0xff]  ;;  %v94_v32 = vld [vmem:[%s3452_s0 + $0x1e8] sm:$0xff]  ;;  %v95_v36 = vld [vmem:[%s3452_s0 + $0x1f0] sm:$0xff] }
   0xf   :  { %v49_v31 = vld [vmem:[%s3452_s0 + $0x80] sm:$0xff]  ;;  %v50_v34 = vld [vmem:[%s3452_s0 + $0x88] sm:$0xff]  ;;  %v51_v38 = vld [vmem:[%s3452_s0 + $0x90] sm:$0xff] }
  0x10   :  { %v73_v35 = vld [vmem:[%s3452_s0 + $0x140] sm:$0xff]  ;;  %v74_v39 = vld [vmem:[%s3452_s0 + $0x148] sm:$0xff]  ;;  %v96_v40 = vld [vmem:[%s3452_s0 + $0x1f8] sm:$0xff] }
  0x11   :  { %1750 = vmatmul.msk.f32.gmra.mxu0 %vm105_vm0, %v34_v5  ;;  %1789 = vmatmul.msk.f32.vlgmr.msra.gmra.mxu1 %vm105_vm0, %v73_v35  ;;  %v52_v42 = vld [vmem:[%s3452_s0 + $0x98] sm:$0xff]  ;;  %v75_v43 = vld [vmem:[%s3452_s0 + $0x150] sm:$0xff]  ;;  %v53_v45 = vld [vmem:[%s3452_s0 + $0xa0] sm:$0xff] }
  0x12   :  { %1801 = vmatmul.msk.f32.gmra.mxu2 %vm105_vm0, %v85_v13  ;;  %v76_v46 = vld [vmem:[%s3452_s0 + $0x158] sm:$0xff]  ;;  %v54_v48 = vld [vmem:[%s3452_s0 + $0xa8] sm:$0xff]  ;;  %v77_v49 = vld [vmem:[%s3452_s0 + $0x160] sm:$0xff] }
  0x13   :  { %v55_v51 = vld [vmem:[%s3452_s0 + $0xb0] sm:$0xff]  ;;  %v78_v52 = vld [vmem:[%s3452_s0 + $0x168] sm:$0xff]  ;;  %v56_v54 = vld [vmem:[%s3452_s0 + $0xb8] sm:$0xff] }
  0x14   :  { %v79_v56 = vld [vmem:[%s3452_s0 + $0x170] sm:$0xff]  ;;  %v57_v58 = vld [vmem:[%s3452_s0 + $0xc0] sm:$0xff]  ;;  %v80_v60 = vld [vmem:[%s3452_s0 + $0x178] sm:$0xff] }
  0x15   :  { %v58_v62 = vld [vmem:[%s3452_s0 + $0xc8] sm:$0xff]  ;;  %v59_v1 = vld [vmem:[%s3452_s0 + $0xd0] sm:$0xff]  ;;  %v60_v4 = vld [vmem:[%s3452_s0 + $0xd8] sm:$0xff] }
  0x16   :  { %v63_v13 = vld [vmem:[%s3452_s0 + $0xf0] sm:$0xff] }
  0x19   :  { %1751 = vmatmul.msk.f32.gmra.mxu0 %vm105_vm0, %v35_v6  ;;  %1790 = vmatmul.msk.f32.gmra.mxu1 %vm105_vm0, %v74_v39 }
  0x1a   :  { %1802 = vmatmul.msk.f32.gmra.mxu2 %vm105_vm0, %v86_v15  ;;  %v2200_v15 = vld [vmem:[%s3455_s3] ss:$0 sm:$0xff] }
  0x21   :  { %1752 = vmatmul.msk.f32.gmra.mxu0 %vm105_vm0, %v36_v7  ;;  %1791 = vmatmul.msk.f32.gmra.mxu1 %vm105_vm0, %v75_v43  ;;  %v61_v7 = vld [vmem:[%s3452_s0 + $0xe0] sm:$0xff]  ;;  %v66_v43 = vld [vmem:[%s3452_s0 + $0x108] sm:$0xff] }
  0x22   :  { %1803 = vmatmul.msk.f32.gmra.mxu2 %vm105_vm0, %v87_v17  ;;  %v64_v17 = vld [vmem:[%s3452_s0 + $0xf8] sm:$0xff] }
  0x29   :  { %1753 = vmatmul.msk.f32.gmra.mxu0 %vm105_vm0, %v37_v8  ;;  %1792 = vmatmul.msk.f32.gmra.mxu1 %vm105_vm0, %v76_v46  ;;  %v81_v46 = vld [vmem:[%s3452_s0 + $0x180] sm:$0xff] }
  0x2a   :  { %1804 = vmatmul.msk.f32.gmra.mxu2 %vm105_vm0, %v88_v19 }
  0x31   :  { %1754 = vmatmul.msk.f32.gmra.mxu0 %vm105_vm0, %v38_v9  ;;  %1793 = vmatmul.msk.f32.gmra.mxu1 %vm105_vm0, %v77_v49 }
  0x32   :  { %1805 = vmatmul.msk.f32.gmra.mxu2 %vm105_vm0, %v89_v21 }
  0x39   :  { %1755 = vmatmul.msk.f32.gmra.mxu0 %vm105_vm0, %v39_v10  ;;  %1794 = vmatmul.msk.f32.gmra.mxu1 %vm105_vm0, %v78_v52  ;;  %v62_v10 = vld [vmem:[%s3452_s0 + $0xe8] sm:$0xff] }
  0x3a   :  { %1806 = vmatmul.msk.f32.gmra.mxu2 %vm105_vm0, %v90_v23 }
  0x41   :  { %1756 = vmatmul.msk.f32.gmra.mxu0 %vm105_vm0, %v40_v12  ;;  %1795 = vmatmul.msk.f32.gmra.mxu1 %vm105_vm0, %v79_v56 }
  0x42   :  { %1807 = vmatmul.msk.f32.gmra.mxu2 %vm105_vm0, %v91_v25 }
  0x49   :  { %1757 = vmatmul.msk.f32.gmra.mxu0 %vm105_vm0, %v41_v14  ;;  %1796 = vmatmul.msk.f32.gmra.mxu1 %vm105_vm0, %v80_v60 }
  0x4a   :  { %1808 = vmatmul.msk.f32.gmra.mxu2 %vm105_vm0, %v92_v27 }
  0x51   :  { %1758 = vmatmul.msk.f32.gmra.mxu0 %vm105_vm0, %v42_v16  ;;  %1797 = vmatmul.msk.f32.gmra.mxu1 %vm105_vm0, %v81_v46 }
  0x52   :  { %1809 = vmatmul.msk.f32.gmra.mxu2 %vm105_vm0, %v93_v29 }
  0x59   :  { %1759 = vmatmul.msk.f32.gmra.mxu0 %vm105_vm0, %v43_v18 }
  0x5a   :  { %1810 = vmatmul.msk.f32.gmra.mxu2 %vm105_vm0, %v94_v32 }
  0x61   :  { %1760 = vmatmul.msk.f32.gmra.mxu0 %vm105_vm0, %v44_v20 }
  0x62   :  { %1811 = vmatmul.msk.f32.gmra.mxu2 %vm105_vm0, %v95_v36 }
  0x69   :  { %1761 = vmatmul.msk.f32.gmra.mxu0 %vm105_vm0, %v45_v22 }
  0x6a   :  { %1812 = vmatmul.msk.f32.gmra.mxu2 %vm105_vm0, %v96_v40 }
  0x71   :  { %1762 = vmatmul.msk.f32.gmra.mxu0 %vm105_vm0, %v46_v24 }
  0x79   :  { %1763 = vmatmul.msk.f32.gmra.mxu0 %vm105_vm0, %v47_v26 }
  0x81   :  { %1764 = vmatmul.msk.f32.gmra.mxu0 %vm105_vm0, %v48_v28  ;;  %v65_v28 = vld [vmem:[%s3452_s0 + $0x100] sm:$0xff] }
  0x86   :  { %v2061_v30 = vpop.f32.mrf.mxu0 }
  0x89   :  { %1765 = vmatmul.msk.f32.gmra.mxu0 %vm105_vm0, %v49_v31 }
  0x8d   :  { %v2144_v55 = vpop.f32.mrf.mxu2 }
  0x8e   :  { %v2071_v33 = vpop.f32.mrf.mxu0 }
  0x91   :  { %1766 = vmatmul.msk.f32.gmra.mxu0 %vm105_vm0, %v50_v34 }
  0x95   :  { %v2154_v59 = vpop.f32.mrf.mxu2 }
  0x96   :  { %v2085_v37 = vpop.f32.mrf.mxu0 }
  0x99   :  { %1767 = vmatmul.msk.f32.gmra.mxu0 %vm105_vm0, %v51_v38 }
  0x9d   :  { %v2164_v63 = vpop.f32.mrf.mxu2 }
  0x9e   :  { %v2099_v41 = vpop.f32.mrf.mxu0 }
  0xa1   :  { %1768 = vmatmul.msk.f32.gmra.mxu0 %vm105_vm0, %v52_v42 }
  0xa5   :  { %v2170_v2 = vpop.f32.mrf.mxu2 }
  0xa6   :  { %v2109_v44 = vpop.f32.mrf.mxu0 }
  0xa9   :  { %1769 = vmatmul.msk.f32.gmra.mxu0 %vm105_vm0, %v53_v45 }
  0xad   :  { %v2176_v5 = vpop.f32.mrf.mxu2 }
  0xae   :  { %v2119_v47 = vpop.f32.mrf.mxu0 }
  0xaf   :  { %v331_v52 = vadd.f32 %v2200_v15, %v2119_v47  ;;  %v67_v47 = vld [vmem:[%s3452_s0 + $0x110] sm:$0xff] }
  0xb1   :  { %1770 = vmatmul.msk.f32.gmra.mxu0 %vm105_vm0, %v54_v48 }
  0xb5   :  { %v2182_v8 = vpop.f32.mrf.mxu2 }
  0xb6   :  { %v2129_v50 = vpop.f32.mrf.mxu0 }
  0xb7   :  { %v334_v48 = vadd.f32 %v2200_v15, %v2129_v50  ;;  %v325_v50 = vadd.f32 %v2200_v15, %v2099_v41 }
  0xb9   :  { %1771 = vmatmul.msk.f32.gmra.mxu0 %vm105_vm0, %v55_v51  ;;  %v2237_v51 = vpop.f32.mrf.mxu1  ;;  %v513_v56 = vmax.f32 %v334_v48, 0.0 }
  0xbd   :  { %v2188_v11 = vpop.f32.mrf.mxu2 }
  0xbe   :  { %v2139_v53 = vpop.f32.mrf.mxu0 }
  0xbf   :  { %v337_v39 = vadd.f32 %v2200_v15, %v2139_v53 }
  0xc1   :  { %1772 = vmatmul.msk.f32.gmra.mxu0 %vm105_vm0, %v56_v54  ;;  %v514_v53 = vmax.f32 %v337_v39, 0.0  ;;  %v328_v54 = vadd.f32 %v2200_v15, %v2109_v44  ;;  %v322_v44 = vadd.f32 %v2200_v15, %v2085_v37  ;;  %v2257_v41 = vpop.f32.mrf.mxu1 }
  0xc5   :  { %v2194_v14 = vpop.f32.mrf.mxu2 }
  0xc6   :  { %v339_v57 = vpop.f32.mrf.mxu0 }
  0xc7   :  { %v340_v36 = vadd.f32 %v2200_v15, %v339_v57  ;;  %v512_v57 = vmax.f32 %v331_v52, 0.0 }
  0xc9   :  { %1773 = vmatmul.msk.f32.gmra.mxu0 %vm105_vm0, %v57_v58  ;;  %v515_v49 = vmax.f32 %v340_v36, 0.0 }
  0xcd   :  { %v2205_v18 = vpop.f32.mrf.mxu2 }
  0xce   :  { %v342_v61 = vpop.f32.mrf.mxu0 }
  0xcf   :  { %v343_v34 = vadd.f32 %v2200_v15, %v342_v61  ;;  %v82_v61 = vld [vmem:[%s3452_s0 + $0x188] sm:$0xff] }
  0xd0   :  { %1798 = vmatmul.msk.f32.gmra.mxu1 %vm105_vm0, %v82_v61 }
  0xd1   :  { %1774 = vmatmul.msk.f32.gmra.mxu0 %vm105_vm0, %v58_v62  ;;  %v516_v40 = vmax.f32 %v343_v34, 0.0  ;;  %v511_v62 = vmax.f32 %v328_v54, 0.0 }
  0xd5   :  { %v2218_v29 = vpop.f32.mrf.mxu2 }
  0xd6   :  { %v345_v0 = vpop.f32.mrf.mxu0 }
  0xd7   :  { %v346_v31 = vadd.f32 %v2200_v15, %v345_v0  ;;  %v319_v0 = vadd.f32 %v2200_v15, %v2071_v33 }
  0xd9   :  { %1775 = vmatmul.msk.f32.gmra.mxu0 %vm105_vm0, %v59_v1  ;;  %v517_v38 = vmax.f32 %v346_v31, 0.0  ;;  %v510_v1 = vmax.f32 %v325_v50, 0.0  ;;  %v508_v37 = vmax.f32 %v319_v0, 0.0 }
  0xdd   :  { %v498_v45 = vpop.f32.mrf.mxu2 }
  0xde   :  { %v348_v3 = vpop.f32.mrf.mxu0 }
  0xdf   :  { %v349_v25 = vadd.f32 %v2200_v15, %v348_v3  ;;  %v316_v3 = vadd.f32 %v2200_v15, %v2061_v30  ;;  %v499_v30 = vadd.f32 %v2200_v15, %v498_v45 }
  0xe1   :  { %1776 = vmatmul.msk.f32.gmra.mxu0 %vm105_vm0, %v60_v4  ;;  %v518_v35 = vmax.f32 %v349_v25, 0.0  ;;  %v509_v4 = vmax.f32 %v322_v44, 0.0 }
  0xe5   :  { %v501_v60 = vpop.f32.mrf.mxu2 }
  0xe6   :  { %v351_v6 = vpop.f32.mrf.mxu0 }
  0xe7   :  { %v352_v23 = vadd.f32 %v2200_v15, %v351_v6  ;;  %v502_v6 = vadd.f32 %v2200_v15, %v501_v60 }
  0xe9   :  { %1777 = vmatmul.msk.f32.gmra.mxu0 %vm105_vm0, %v61_v7  ;;  %v519_v32 = vmax.f32 %v352_v23, 0.0  ;;  %v490_v23 = vadd.f32 %v2200_v15, %v2194_v14  ;;  %v481_v14 = vadd.f32 %v2200_v15, %v2176_v5  ;;  %v472_v5 = vadd.f32 %v2200_v15, %v2154_v59 }
  0xeb   :  { %v562_v39 = vmax.f32 %v481_v14, 0.0  ;;  %v559_v46 = vmax.f32 %v472_v5, 0.0 }
  0xed   :  { %v504_v33 = vpop.f32.mrf.mxu2 }
  0xee   :  { %v354_v9 = vpop.f32.mrf.mxu0 }
  0xef   :  { %v355_v21 = vadd.f32 %v2200_v15, %v354_v9  ;;  %v68_v9 = vld [vmem:[%s3452_s0 + $0x118] sm:$0xff] }
  0xf1   :  { %1778 = vmatmul.msk.f32.gmra.mxu0 %vm105_vm0, %v62_v10  ;;  %v520_v26 = vmax.f32 %v355_v21, 0.0  ;;  %v83_v10 = vld [vmem:[%s3452_s0 + $0x190] sm:$0xff]  ;;  %v493_v21 = vadd.f32 %v2200_v15, %v2205_v18  ;;  %v484_v18 = vadd.f32 %v2200_v15, %v2182_v8  ;;  %v70_v8 = vld [vmem:[%s3452_s0 + $0x128] sm:$0xff] }
  0xf2   :  { %1799 = vmatmul.msk.f32.gmra.mxu1 %vm105_vm0, %v83_v10 }
  0xf3   :  { %v563_v36 = vmax.f32 %v484_v18, 0.0 }
  0xf6   :  { %v357_v12 = vpop.f32.mrf.mxu0 }
  0xf7   :  { %v358_v19 = vadd.f32 %v2200_v15, %v357_v12  ;;  %v507_v12 = vmax.f32 %v316_v3, 0.0 }
  0xf9   :  { %1779 = vmatmul.msk.f32.gmra.mxu0 %vm105_vm0, %v63_v13  ;;  %v521_v24 = vmax.f32 %v358_v19, 0.0  ;;  %v505_v13 = vadd.f32 %v2200_v15, %v504_v33  ;;  %v569_v19 = vmax.f32 %v502_v6, 0.0 }
  0xfe   :  { %v360_v16 = vpop.f32.mrf.mxu0 }
  0xff   :  { %v361_v20 = vadd.f32 %v2200_v15, %v360_v16  ;;  %v2276_v16 = vpop.f32.mrf.mxu1 }
 0x100   :  { %v442_v3 = vadd.f32 %v2200_v15, %v2276_v16 }
 0x101   :  { %1780 = vmatmul.msk.f32.gmra.mxu0 %vm105_vm0, %v64_v17  ;;  %v522_v22 = vmax.f32 %v361_v20, 0.0  ;;  %v496_v17 = vadd.f32 %v2200_v15, %v2218_v29  ;;  %v570_v20 = vmax.f32 %v505_v13, 0.0  ;;  %v566_v29 = vmax.f32 %v493_v21, 0.0 }
 0x102   :  { %v549_v33 = vmax.f32 %v442_v3, 0.0 }
 0x103   :  { %582 = vmatpush.msrb.mxu1 %v522_v22  ;;  %v568_v22 = vmax.f32 %v499_v30, 0.0 }
 0x105   :  { %583 = vmatpush.msrb.mxu1 %v521_v24  ;;  %v567_v24 = vmax.f32 %v496_v17, 0.0 }
 0x106   :  { %v2213_v27 = vpop.f32.mrf.mxu0 }
 0x107   :  { %584 = vmatpush.msrb.mxu1 %v520_v26  ;;  %v69_v26 = vld [vmem:[%s3452_s0 + $0x120] sm:$0xff]  ;;  %v444_v31 = vpop.f32.mrf.mxu1 }
 0x109   :  { %1781 = vmatmul.msk.f32.gmra.mxu0 %vm105_vm0, %v65_v28  ;;  %585 = vmatpush.msrb.mxu1 %v519_v32  ;;  %v487_v28 = vadd.f32 %v2200_v15, %v2188_v11  ;;  %v565_v32 = vmax.f32 %v490_v23, 0.0 }
 0x10b   :  { %586 = vmatpush.msrb.mxu1 %v518_v35  ;;  %v564_v34 = vmax.f32 %v487_v28, 0.0  ;;  %v478_v35 = vadd.f32 %v2200_v15, %v2170_v2  ;;  %v469_v2 = vadd.f32 %v2200_v15, %v2144_v55  ;;  %v72_v55 = vld [vmem:[%s3452_s0 + $0x138] sm:$0xff] }
 0x10d   :  { %587 = vmatpush.msrb.mxu1 %v517_v38  ;;  %v475_v38 = vadd.f32 %v2200_v15, %v2164_v63  ;;  %v71_v63 = vld [vmem:[%s3452_s0 + $0x130] sm:$0xff] }
 0x10e   :  { %v2226_v42 = vpop.f32.mrf.mxu0 }
 0x10f   :  { %588 = vmatpush.msrb.mxu1 %v516_v40  ;;  %v447_v40 = vpop.f32.mrf.mxu1  ;;  %v560_v45 = vmax.f32 %v475_v38, 0.0 }
 0x110   :  { %v448_v60 = vadd.f32 %v2200_v15, %v447_v40 }
 0x111   :  { %1782 = vmatmul.msk.f32.gmra.mxu0 %vm105_vm0, %v66_v43  ;;  %589 = vmatpush.msrb.mxu1 %v515_v49  ;;  %v561_v43 = vmax.f32 %v478_v35, 0.0  ;;  %v558_v49 = vmax.f32 %v469_v2, 0.0 }
 0x113   :  { %590 = vmatpush.msrb.mxu1 %v514_v53 }
 0x115   :  { %591 = vmatpush.msrb.mxu1 %v513_v56 }
 0x116   :  { %v2246_v58 = vpop.f32.mrf.mxu0 }
 0x117   :  { %592 = vmatpush.msrb.mxu1 %v512_v57  ;;  %v450_v59 = vpop.f32.mrf.mxu1 }
 0x118   :  { %v451_v57 = vadd.f32 %v2200_v15, %v450_v59 }
 0x119   :  { %1783 = vmatmul.msk.f32.gmra.mxu0 %vm105_vm0, %v67_v47  ;;  %593 = vmatpush.msrb.mxu1 %v511_v62  ;;  %v445_v62 = vadd.f32 %v2200_v15, %v444_v31 }
 0x11a   :  { %v552_v0 = vmax.f32 %v451_v57, 0.0 }
 0x11b   :  { %594 = vmatpush.msrb.mxu1 %v510_v1  ;;  %v550_v6 = vmax.f32 %v445_v62, 0.0 }
 0x11d   :  { %595 = vmatpush.msrb.mxu1 %v509_v4  ;;  %v551_v4 = vmax.f32 %v448_v60, 0.0 }
 0x11e   :  { %v2265_v7 = vpop.f32.mrf.mxu0 }
 0x11f   :  { %596 = vmatpush.msrb.mxu1 %v508_v37  ;;  %v453_v53 = vpop.f32.mrf.mxu1  ;;  %v439_v37 = vadd.f32 %v2200_v15, %v2257_v41 }
 0x120   :  { %v454_v56 = vadd.f32 %v2200_v15, %v453_v53 }
 0x121   :  { %1784 = vmatmul.msk.f32.gmra.mxu0 %vm105_vm0, %v68_v9  ;;  %597 = vmatpush.msrb.mxu1 %v507_v12  ;;  %v436_v9 = vadd.f32 %v2200_v15, %v2237_v51  ;;  %v548_v10 = vmax.f32 %v439_v37, 0.0 }
 0x122   :  { %v553_v61 = vmax.f32 %v454_v56, 0.0 }
 0x123   :  { %642 = vmatpush.msra.mxu1 %v570_v20  ;;  %v547_v30 = vmax.f32 %v436_v9, 0.0 }
 0x125   :  { %643 = vmatpush.msra.mxu1 %v569_v19 }
 0x126   :  { %v2285_v25 = vpop.f32.mrf.mxu0 }
 0x127   :  { %644 = vmatpush.msra.mxu1 %v568_v22  ;;  %v456_v50 = vpop.f32.mrf.mxu1 }
 0x128   :  { %v457_v47 = vadd.f32 %v2200_v15, %v456_v50 }
 0x129   :  { %1785 = vmatmul.msk.f32.gmra.mxu0 %vm105_vm0, %v69_v26  ;;  %645 = vmatpush.msra.mxu1 %v567_v24 }
 0x12a   :  { %v554_v44 = vmax.f32 %v457_v47, 0.0 }
 0x12b   :  { %646 = vmatpush.msra.mxu1 %v566_v29 }
 0x12c   :  { %622 = vmatpush.msra.mxu3 %v554_v44 }
 0x12d   :  { %647 = vmatpush.msra.mxu1 %v565_v32 }
 0x12e   :  { %v2299_v11 = vpop.f32.mrf.mxu0  ;;  %623 = vmatpush.msra.mxu3 %v553_v61 }
 0x12f   :  { %648 = vmatpush.msra.mxu1 %v564_v34  ;;  %v459_v38 = vpop.f32.mrf.mxu1 }
 0x130   :  { %624 = vmatpush.msra.mxu3 %v552_v0 }
 0x131   :  { %1786 = vmatmul.msk.f32.gmra.mxu0 %vm105_vm0, %v70_v8  ;;  %649 = vmatpush.msra.mxu1 %v563_v36 }
 0x132   :  { %625 = vmatpush.msra.mxu3 %v551_v4 }
 0x133   :  { %650 = vmatpush.msra.mxu1 %v562_v39 }
 0x134   :  { %626 = vmatpush.msra.mxu3 %v550_v6 }
 0x135   :  { %651 = vmatpush.msra.mxu1 %v561_v43  ;;  %v379_v43 = vadd.f32 %v2200_v15, %v2299_v11  ;;  %v367_v11 = vadd.f32 %v2200_v15, %v2226_v42 }
 0x136   :  { %v2311_v48 = vpop.f32.mrf.mxu0  ;;  %627 = vmatpush.msra.mxu3 %v549_v33 }
 0x137   :  { %652 = vmatpush.msra.mxu1 %v560_v45  ;;  %v382_v40 = vadd.f32 %v2200_v15, %v2311_v48  ;;  %v376_v45 = vadd.f32 %v2200_v15, %v2285_v25  ;;  %v370_v48 = vadd.f32 %v2200_v15, %v2246_v58  ;;  %v364_v25 = vadd.f32 %v2200_v15, %v2213_v27  ;;  %v571_v27 = vld [vmem:[%s3453_s1] sm:$0xff] }
 0x138   :  { %628 = vmatpush.msra.mxu3 %v548_v10  ;;  %v524_v56 = vmax.f32 %v367_v11, 0.0  ;;  %v460_v58 = vadd.f32 %v2200_v15, %v459_v38  ;;  %573 = vst [vmem:[#allocation1] ss:$4 sm:$0xff] %v571_v27  ;;  %v670_v38 = vld [vmem:[%s3456_s4 + $0x40] sm:$0xff]  ;;  %v692_v27 = vld [vmem:[%s3456_s4 + $0xf0] sm:$0xff] }
 0x139   :  { %1787 = vmatmul.msk.f32.gmra.mxu0 %vm105_vm0, %v71_v63  ;;  %653 = vmatpush.msra.mxu1 %v559_v46  ;;  %v529_v46 = vmax.f32 %v382_v40, 0.0  ;;  %v373_v63 = vadd.f32 %v2200_v15, %v2265_v7  ;;  %v523_v60 = vmax.f32 %v364_v25, 0.0  ;;  %v713_v40 = vld [vmem:[%s3456_s4 + $0x198] sm:$0xff] }
 0x13a   :  { %629 = vmatpush.msra.mxu3 %v547_v30  ;;  %v555_v44 = vmax.f32 %v460_v58, 0.0  ;;  %v724_v58 = vld [vmem:[%s3456_s4 + $0x1f0] sm:$0xff] }
 0x13b   :  { %654 = vmatpush.msra.mxu1 %v558_v49  ;;  %v528_v49 = vmax.f32 %v379_v43, 0.0  ;;  %v526_v53 = vmax.f32 %v373_v63, 0.0  ;;  %v696_v43 = vld [vmem:[%s3456_s4 + $0x110] sm:$0xff]  ;;  %v681_v63 = vld [vmem:[%s3456_s4 + $0x98] sm:$0xff] }
 0x13e   :  { %v384_v52 = vpop.f32.mrf.mxu0 }
 0x13f   :  { %v385_v36 = vadd.f32 %v2200_v15, %v384_v52  ;;  %v575_v0 = vld.sshfl [vmem:[#allocation1 + $0x8] sm:$0xff pattern:$0x73625140]  ;;  %v574_v3 = vld.sshfl [vmem:[#allocation1] sm:$0xff pattern:$0x73625140] }
 0x140   :  { %598 = vmatmul.f32.vlgmr.msrb.gmra.mxu1 %v574_v3  ;;  %v577_v37 = vld.sshfl [vmem:[#allocation1 + $0x18] sm:$0xff pattern:$0x73625140]  ;;  %v716_v3 = vld [vmem:[%s3456_s4 + $0x1b0] sm:$0xff] }
 0x141   :  { %1788 = vmatmul.msk.f32.gmra.mxu0 %vm105_vm0, %v72_v55  ;;  %v530_v2 = vmax.f32 %v385_v36, 0.0  ;;  %v527_v55 = vmax.f32 %v376_v45, 0.0  ;;  %v662_v36 = vld [vmem:[%s3456_s4] sm:$0xff]  ;;  %v705_v45 = vld [vmem:[%s3456_s4 + $0x158] sm:$0xff] }
 0x146   :  { %v387_v54 = vpop.f32.mrf.mxu0 }
 0x147   :  { %v388_v34 = vadd.f32 %v2200_v15, %v387_v54  ;;  %v525_v54 = vmax.f32 %v370_v48, 0.0  ;;  %v673_v48 = vld [vmem:[%s3456_s4 + $0x58] sm:$0xff] }
 0x149   :  { %v531_v5 = vmax.f32 %v388_v34, 0.0  ;;  %v679_v34 = vld [vmem:[%s3456_s4 + $0x88] sm:$0xff] }
 0x14d   :  { %v462_v59 = vpop.f32.mrf.mxu1 }
 0x14e   :  { %v390_v1 = vpop.f32.mrf.mxu0  ;;  %v463_v7 = vadd.f32 %v2200_v15, %v462_v59  ;;  %v664_v59 = vld [vmem:[%s3456_s4 + $0x10] sm:$0xff] }
 0x14f   :  { %v391_v32 = vadd.f32 %v2200_v15, %v390_v1 }
 0x150   :  { %v556_v42 = vmax.f32 %v463_v7, 0.0 }
 0x151   :  { %v532_v8 = vmax.f32 %v391_v32, 0.0  ;;  %v702_v32 = vld [vmem:[%s3456_s4 + $0x140] sm:$0xff] }
 0x156   :  { %v393_v12 = vpop.f32.mrf.mxu0 }
 0x157   :  { %v394_v31 = vadd.f32 %v2200_v15, %v393_v12 }
 0x159   :  { %v533_v35 = vmax.f32 %v394_v31, 0.0  ;;  %v711_v31 = vld [vmem:[%s3456_s4 + $0x188] sm:$0xff] }
 0x15e   :  { %v396_v13 = vpop.f32.mrf.mxu0 }
 0x15f   :  { %v397_v26 = vadd.f32 %v2200_v15, %v396_v13 }
 0x161   :  { %v534_v14 = vmax.f32 %v397_v26, 0.0  ;;  %v576_v26 = vld.sshfl [vmem:[#allocation1 + $0x10] sm:$0xff pattern:$0x73625140] }
 0x166   :  { %v399_v16 = vpop.f32.mrf.mxu0 }
 0x167   :  { %v400_v23 = vadd.f32 %v2200_v15, %v399_v16 }
 0x169   :  { %v535_v18 = vmax.f32 %v400_v23, 0.0 }
 0x16e   :  { %v402_v17 = vpop.f32.mrf.mxu0 }
 0x16f   :  { %v403_v51 = vadd.f32 %v2200_v15, %v402_v17  ;;  %v465_v50 = vpop.f32.mrf.mxu1 }
 0x170   :  { %v466_v47 = vadd.f32 %v2200_v15, %v465_v50  ;;  %v714_v50 = vld [vmem:[%s3456_s4 + $0x1a0] sm:$0xff] }
 0x171   :  { %v536_v28 = vmax.f32 %v403_v51, 0.0 }
 0x172   :  { %v557_v61 = vmax.f32 %v466_v47, 0.0  ;;  %v698_v47 = vld [vmem:[%s3456_s4 + $0x120] sm:$0xff] }
 0x174   :  { %655 = vmatpush.msra.mxu1 %v557_v61  ;;  %v682_v61 = vld [vmem:[%s3456_s4 + $0xa0] sm:$0xff] }
 0x176   :  { %v405_v19 = vpop.f32.mrf.mxu0  ;;  %656 = vmatpush.msra.mxu1 %v556_v42  ;;  %v708_v42 = vld [vmem:[%s3456_s4 + $0x170] sm:$0xff] }
 0x177   :  { %v406_v41 = vadd.f32 %v2200_v15, %v405_v19 }
 0x178   :  { %657 = vmatpush.msra.mxu1 %v555_v44  ;;  %v683_v44 = vld [vmem:[%s3456_s4 + $0xa8] sm:$0xff] }
 0x179   :  { %v537_v24 = vmax.f32 %v406_v41, 0.0  ;;  %658 = vmatmul.f32.vlgmr.msra.gmra.mxu1 %v577_v37  ;;  %v700_v37 = vld [vmem:[%s3456_s4 + $0x130] sm:$0xff] }
 0x17e   :  { %v408_v20 = vpop.f32.mrf.mxu0 }
 0x17f   :  { %v409_v21 = vadd.f32 %v2200_v15, %v408_v20 }
 0x181   :  { %v538_v22 = vmax.f32 %v409_v21, 0.0 }
 0x183   :  { %602 = vmatpush.msrb.mxu2 %v538_v22 }
 0x185   :  { %603 = vmatpush.msrb.mxu2 %v537_v24 }
 0x186   :  { %v2337_v29 = vpop.f32.mrf.mxu0 }
 0x187   :  { %604 = vmatpush.msrb.mxu2 %v536_v28  ;;  %v412_v51 = vadd.f32 %v2200_v15, %v2337_v29  ;;  %v710_v28 = vld [vmem:[%s3456_s4 + $0x180] sm:$0xff] }
 0x188   :  { %v694_v29 = vld [vmem:[%s3456_s4 + $0x100] sm:$0xff] }
 0x189   :  { %605 = vmatpush.msrb.mxu2 %v535_v18  ;;  %v539_v24 = vmax.f32 %v412_v51, 0.0  ;;  %v695_v18 = vld [vmem:[%s3456_s4 + $0x108] sm:$0xff] }
 0x18a   :  { %v1165_v51 = vld [vmem:[%s3458_s6 + $0xe8] sm:$0xff] }
 0x18b   :  { %606 = vmatpush.msrb.mxu2 %v534_v14  ;;  %v678_v14 = vld [vmem:[%s3456_s4 + $0x80] sm:$0xff] }
 0x18d   :  { %607 = vmatpush.msrb.mxu2 %v533_v35  ;;  %v686_v35 = vld [vmem:[%s3456_s4 + $0xc0] sm:$0xff] }
 0x18e   :  { %v2343_v39 = vpop.f32.mrf.mxu0 }
 0x18f   :  { %608 = vmatpush.msrb.mxu2 %v532_v8  ;;  %v415_v41 = vadd.f32 %v2200_v15, %v2343_v39  ;;  %v663_v8 = vld [vmem:[%s3456_s4 + $0x8] sm:$0xff]  ;;  %v712_v39 = vld [vmem:[%s3456_s4 + $0x190] sm:$0xff] }
 0x191   :  { %609 = vmatpush.msrb.mxu2 %v531_v5  ;;  %v540_v23 = vmax.f32 %v415_v41, 0.0  ;;  %v721_v5 = vld [vmem:[%s3456_s4 + $0x1d8] sm:$0xff]  ;;  %v687_v41 = vld [vmem:[%s3456_s4 + $0xc8] sm:$0xff] }
 0x193   :  { %610 = vmatpush.msrb.mxu2 %v530_v2  ;;  %v697_v2 = vld [vmem:[%s3456_s4 + $0x118] sm:$0xff] }
 0x195   :  { %611 = vmatpush.msrb.mxu2 %v529_v46  ;;  %v680_v46 = vld [vmem:[%s3456_s4 + $0x90] sm:$0xff] }
 0x196   :  { %v417_v52 = vpop.f32.mrf.mxu0 }
 0x197   :  { %612 = vmatpush.msrb.mxu2 %v528_v49  ;;  %v418_v19 = vadd.f32 %v2200_v15, %v417_v52  ;;  %v689_v49 = vld [vmem:[%s3456_s4 + $0xd8] sm:$0xff] }
 0x198   :  { %v665_v52 = vld [vmem:[%s3456_s4 + $0x18] sm:$0xff] }
 0x199   :  { %613 = vmatpush.msrb.mxu2 %v527_v55  ;;  %v541_v22 = vmax.f32 %v418_v19, 0.0  ;;  %v704_v19 = vld [vmem:[%s3456_s4 + $0x150] sm:$0xff] }
 0x19b   :  { %614 = vmatpush.msrb.mxu2 %v526_v53 }
 0x19d   :  { %615 = vmatpush.msrb.mxu2 %v525_v54 }
 0x19e   :  { %v420_v57 = vpop.f32.mrf.mxu0 }
 0x19f   :  { %616 = vmatpush.msrb.mxu2 %v524_v56  ;;  %v421_v16 = vadd.f32 %v2200_v15, %v420_v57  ;;  %v715_v57 = vld [vmem:[%s3456_s4 + $0x1a8] sm:$0xff] }
 0x1a1   :  { %617 = vmatpush.msrb.mxu2 %v523_v60  ;;  %v542_v21 = vmax.f32 %v421_v16, 0.0  ;;  %v699_v60 = vld [vmem:[%s3456_s4 + $0x128] sm:$0xff]  ;;  %v1167_v16 = vld [vmem:[%s3458_s6 + $0xf8] sm:$0xff] }
 0x1a2   :  { %618 = vmatmul.f32.vlgmr.msrb.gmra.mxu2 %v575_v0  ;;  %v667_v0 = vld [vmem:[%s3456_s4 + $0x28] sm:$0xff] }
 0x1a3   :  { %777 = vmatpush.msra.mxu2 %v710_v28  ;;  %v1164_v28 = vld [vmem:[%s3458_s6 + $0xe0] sm:$0xff] }
 0x1a5   :  { %778 = vmatpush.msra.mxu2 %v694_v29  ;;  %v1163_v29 = vld [vmem:[%s3458_s6 + $0xd8] sm:$0xff] }
 0x1a6   :  { %v423_v62 = vpop.f32.mrf.mxu0 }
 0x1a7   :  { %v424_v30 = vadd.f32 %v2200_v15, %v423_v62  ;;  %779 = vmatpush.msra.mxu2 %v678_v14  ;;  %v666_v62 = vld [vmem:[%s3456_s4 + $0x20] sm:$0xff]  ;;  %v1162_v14 = vld [vmem:[%s3458_s6 + $0xd0] sm:$0xff] }
 0x1a9   :  { %v543_v20 = vmax.f32 %v424_v30, 0.0  ;;  %780 = vmatpush.msra.mxu2 %v662_v36  ;;  %v719_v30 = vld [vmem:[%s3456_s4 + $0x1c8] sm:$0xff]  ;;  %v725_v36 = vld [vmem:[%s3456_s4 + $0x1f8] sm:$0xff] }
 0x1ab   :  { %817 = vmatpush.msrb.mxu2 %v712_v39  ;;  %v709_v39 = vld [vmem:[%s3456_s4 + $0x178] sm:$0xff] }
 0x1ad   :  { %818 = vmatpush.msrb.mxu2 %v696_v43  ;;  %v693_v43 = vld [vmem:[%s3456_s4 + $0xf8] sm:$0xff] }
 0x1ae   :  { %v426_v1 = vpop.f32.mrf.mxu0 }
 0x1af   :  { %v427_v10 = vadd.f32 %v2200_v15, %v426_v1  ;;  %819 = vmatpush.msrb.mxu2 %v680_v46  ;;  %v676_v1 = vld [vmem:[%s3456_s4 + $0x70] sm:$0xff]  ;;  %v677_v46 = vld [vmem:[%s3456_s4 + $0x78] sm:$0xff] }
 0x1b1   :  { %v544_v17 = vmax.f32 %v427_v10, 0.0  ;;  %820 = vmatpush.msrb.mxu2 %v664_v59  ;;  %v668_v10 = vld [vmem:[%s3456_s4 + $0x30] sm:$0xff] }
 0x1b2   :  { %v1158_v59 = vld [vmem:[%s3458_s6 + $0xb0] sm:$0xff] }
 0x1b6   :  { %v429_v4 = vpop.f32.mrf.mxu0 }
 0x1b7   :  { %v430_v9 = vadd.f32 %v2200_v15, %v429_v4  ;;  %v717_v4 = vld [vmem:[%s3456_s4 + $0x1b8] sm:$0xff] }
 0x1b9   :  { %v545_v13 = vmax.f32 %v430_v9, 0.0  ;;  %v684_v9 = vld [vmem:[%s3456_s4 + $0xb0] sm:$0xff] }
 0x1bd   :  { %v599_v55 = vpop.f32.mrf.mxu1 }
 0x1be   :  { %v432_v6 = vpop.f32.mrf.mxu0 }
 0x1bf   :  { %v433_v33 = vadd.f32 %v2200_v15, %v432_v6  ;;  %v718_v15 = vld [vmem:[%s3456_s4 + $0x1c0] sm:$0xff]  ;;  %v701_v6 = vld [vmem:[%s3456_s4 + $0x138] sm:$0xff] }
 0x1c0   :  { %937 = vmatpush.msrb.mxu1 %v718_v15  ;;  %v707_v15 = vld [vmem:[%s3456_s4 + $0x168] sm:$0xff] }
 0x1c1   :  { %v546_v12 = vmax.f32 %v433_v33, 0.0  ;;  %v685_v33 = vld [vmem:[%s3456_s4 + $0xb8] sm:$0xff] }
 0x1c2   :  { %938 = vmatpush.msrb.mxu1 %v702_v32  ;;  %v691_v32 = vld [vmem:[%s3456_s4 + $0xe8] sm:$0xff] }
 0x1c3   :  { %630 = vmatpush.msra.mxu3 %v546_v12  ;;  %v669_v12 = vld [vmem:[%s3456_s4 + $0x38] sm:$0xff] }
 0x1c4   :  { %939 = vmatpush.msrb.mxu1 %v686_v35  ;;  %v675_v35 = vld [vmem:[%s3456_s4 + $0x68] sm:$0xff] }
 0x1c5   :  { %631 = vmatpush.msra.mxu3 %v545_v13  ;;  %v720_v13 = vld [vmem:[%s3456_s4 + $0x1d0] sm:$0xff] }
 0x1c6   :  { %940 = vmatpush.msrb.mxu1 %v670_v38  ;;  %v1161_v38 = vld [vmem:[%s3458_s6 + $0xc8] sm:$0xff] }
 0x1c7   :  { %632 = vmatpush.msra.mxu3 %v544_v17  ;;  %v703_v17 = vld [vmem:[%s3456_s4 + $0x148] sm:$0xff] }
 0x1c8   :  { %997 = vmatpush.msra.mxu1 %v721_v5  ;;  %v1160_v5 = vld [vmem:[%s3458_s6 + $0xc0] sm:$0xff] }
 0x1c9   :  { %633 = vmatpush.msra.mxu3 %v543_v20  ;;  %v1166_v20 = vld [vmem:[%s3458_s6 + $0xf0] sm:$0xff] }
 0x1ca   :  { %998 = vmatpush.msra.mxu1 %v705_v45  ;;  %v1159_v45 = vld [vmem:[%s3458_s6 + $0xb8] sm:$0xff] }
 0x1cb   :  { %634 = vmatpush.msra.mxu3 %v542_v21  ;;  %v688_v21 = vld [vmem:[%s3456_s4 + $0xd0] sm:$0xff] }
 0x1cc   :  { %999 = vmatpush.msra.mxu1 %v689_v49  ;;  %v1231_v49 = vld [vmem:[%s3458_s6 + $0x2f8] sm:$0xff] }
 0x1cd   :  { %635 = vmatpush.msra.mxu3 %v541_v22  ;;  %v671_v22 = vld [vmem:[%s3456_s4 + $0x48] sm:$0xff] }
 0x1ce   :  { %1000 = vmatpush.msra.mxu1 %v673_v48  ;;  %v1230_v48 = vld [vmem:[%s3458_s6 + $0x2f0] sm:$0xff] }
 0x1cf   :  { %636 = vmatpush.msra.mxu3 %v540_v23  ;;  %v672_v23 = vld [vmem:[%s3456_s4 + $0x50] sm:$0xff] }
 0x1d1   :  { %637 = vmatpush.msra.mxu3 %v539_v24  ;;  %v722_v24 = vld [vmem:[%s3456_s4 + $0x1e0] sm:$0xff] }
 0x1d2   :  { %638 = vmatmul.f32.vlgmr.msra.gmra.mxu3 %v576_v26  ;;  %v723_v26 = vld [vmem:[%s3456_s4 + $0x1e8] sm:$0xff] }
 0x1d3   :  { %797 = vmatpush.msrb.mxu3 %v711_v31  ;;  %v706_v31 = vld [vmem:[%s3456_s4 + $0x160] sm:$0xff] }
 0x1d5   :  { %798 = vmatpush.msrb.mxu3 %v695_v18  ;;  %v690_v18 = vld [vmem:[%s3456_s4 + $0xe0] sm:$0xff] }
 0x1d7   :  { %799 = vmatpush.msrb.mxu3 %v679_v34  ;;  %v674_v34 = vld [vmem:[%s3456_s4 + $0x60] sm:$0xff] }
 0x1d9   :  { %800 = vmatpush.msrb.mxu3 %v663_v8  ;;  %v1151_v8 = vld [vmem:[%s3458_s6 + $0x78] sm:$0xff] }
 0x1db   :  { %837 = vmatpush.msra.mxu3 %v713_v40  ;;  %v1150_v40 = vld [vmem:[%s3458_s6 + $0x70] sm:$0xff] }
 0x1dd   :  { %838 = vmatpush.msra.mxu3 %v697_v2  ;;  %v1149_v2 = vld [vmem:[%s3458_s6 + $0x68] sm:$0xff] }
 0x1df   :  { %839 = vmatpush.msra.mxu3 %v681_v63  ;;  %v1148_v63 = vld [vmem:[%s3458_s6 + $0x60] sm:$0xff] }
 0x1e1   :  { %840 = vmatpush.msra.mxu3 %v665_v52  ;;  %v1147_v52 = vld [vmem:[%s3458_s6 + $0x58] sm:$0xff] }
 0x1f6   :  { %v659_v54 = vpop.f32.mrf.mxu1 }
 0x225   :  { %v619_v11 = vpop.f32.mrf.mxu2 }
 0x226   :  { %v620_v53 = vadd.f32 %v619_v11, %v599_v55  ;;  %v1157_v55 = vld [vmem:[%s3458_s6 + $0xa8] sm:$0xff]  ;;  %v1146_v11 = vld [vmem:[%s3458_s6 + $0x50] sm:$0xff] }
 0x255   :  { %v639_v25 = vpop.f32.mrf.mxu3 }
 0x256   :  { %v640_v7 = vadd.f32 %v639_v25, %v620_v53  ;;  %v1229_v53 = vld [vmem:[%s3458_s6 + $0x2e8] sm:$0xff]  ;;  %v1156_v25 = vld [vmem:[%s3458_s6 + $0xa0] sm:$0xff] }
 0x258   :  { %v2447_v56 = vadd.f32 %v659_v54, %v640_v7  ;;  %v1145_v54 = vld [vmem:[%s3458_s6 + $0x48] sm:$0xff]  ;;  %v1155_v7 = vld [vmem:[%s3458_s6 + $0x98] sm:$0xff] }
 0x25a   :  { %1813 = vmatmul.msk.f32.vlgmr.msra.gmra.mxu2 %vm105_vm0, %v2447_v56  ;;  %1814 = vmatmul.msk.f32.vlgmr.msrb.gmra.mxu3 %vm105_vm0, %v2447_v56 }
 0x25b   :  { %1821 = vmatmul.msk.f32.vlgmr.msrb.gmra.mxu1 %vm105_vm0, %v2447_v56  ;;  %857 = vmatpush.msra.mxu2 %v714_v50  ;;  %v1144_v50 = vld [vmem:[%s3458_s6 + $0x40] sm:$0xff] }
 0x25c   :  { %877 = vmatpush.msrb.mxu3 %v715_v57  ;;  %1057 = vmatpush.msrb.mxu1 %v724_v58  ;;  %v1228_v57 = vld [vmem:[%s3458_s6 + $0x2e0] sm:$0xff]  ;;  %v1154_v58 = vld [vmem:[%s3458_s6 + $0x90] sm:$0xff] }
 0x25d   :  { %858 = vmatpush.msra.mxu2 %v698_v47  ;;  %v1143_v47 = vld [vmem:[%s3458_s6 + $0x38] sm:$0xff] }
 0x25e   :  { %878 = vmatpush.msrb.mxu3 %v699_v60  ;;  %1058 = vmatpush.msrb.mxu1 %v708_v42  ;;  %v1227_v60 = vld [vmem:[%s3458_s6 + $0x2d8] sm:$0xff]  ;;  %v1153_v42 = vld [vmem:[%s3458_s6 + $0x88] sm:$0xff] }
 0x25f   :  { %859 = vmatpush.msra.mxu2 %v682_v61  ;;  %v1142_v61 = vld [vmem:[%s3458_s6 + $0x30] sm:$0xff] }
 0x260   :  { %879 = vmatpush.msrb.mxu3 %v683_v44  ;;  %1059 = vmatpush.msrb.mxu1 %v692_v27  ;;  %v1152_v44 = vld [vmem:[%s3458_s6 + $0x80] sm:$0xff]  ;;  %v1141_v27 = vld [vmem:[%s3458_s6 + $0x28] sm:$0xff] }
 0x261   :  { %860 = vmatpush.msra.mxu2 %v666_v62  ;;  %v1225_v62 = vld [vmem:[%s3458_s6 + $0x2c8] sm:$0xff] }
 0x262   :  { %1815 = vmatmul.msk.f32.vlgmr.msrb.gmra.mxu2 %vm105_vm0, %v2447_v56  ;;  %1816 = vmatmul.msk.f32.vlgmr.msra.gmra.mxu3 %vm105_vm0, %v2447_v56 }
 0x263   :  { %1824 = vmatmul.msk.f32.vlgmr.msra.gmra.mxu1 %vm105_vm0, %v2447_v56  ;;  %880 = vmatpush.msrb.mxu3 %v667_v0  ;;  %v1215_v0 = vld [vmem:[%s3458_s6 + $0x278] sm:$0xff] }
 0x264   :  { %1060 = vmatpush.msrb.mxu1 %v676_v1  ;;  %897 = vmatpush.msrb.mxu2 %v716_v3  ;;  %v1140_v1 = vld [vmem:[%s3458_s6 + $0x20] sm:$0xff] }
 0x265   :  { %917 = vmatpush.msra.mxu3 %v717_v4  ;;  %v1224_v3 = vld [vmem:[%s3458_s6 + $0x2c0] sm:$0xff]  ;;  %v1214_v4 = vld [vmem:[%s3458_s6 + $0x270] sm:$0xff] }
 0x266   :  { %898 = vmatpush.msrb.mxu2 %v700_v37  ;;  %1416 = vmatpush.msra.mxu1 %v1167_v16  ;;  %v1139_v37 = vld [vmem:[%s3458_s6 + $0x18] sm:$0xff] }
 0x267   :  { %918 = vmatpush.msra.mxu3 %v701_v6  ;;  %v1223_v6 = vld [vmem:[%s3458_s6 + $0x2b8] sm:$0xff] }
 0x268   :  { %899 = vmatpush.msrb.mxu2 %v684_v9  ;;  %1417 = vmatpush.msra.mxu1 %v1166_v20  ;;  %v1213_v9 = vld [vmem:[%s3458_s6 + $0x268] sm:$0xff]  ;;  %v1211_v16 = vld [vmem:[%s3458_s6 + $0x258] sm:$0xff] }
 0x269   :  { %919 = vmatpush.msra.mxu3 %v685_v33  ;;  %v1138_v33 = vld [vmem:[%s3458_s6 + $0x10] sm:$0xff]  ;;  %v1183_v20 = vld [vmem:[%s3458_s6 + $0x178] sm:$0xff] }
 0x26a   :  { %1817 = vmatmul.msk.f32.vlgmr.msra.gmra.mxu2 %vm105_vm0, %v2447_v56  ;;  %1818 = vmatmul.msk.f32.vlgmr.msrb.gmra.mxu3 %vm105_vm0, %v2447_v56 }
 0x26b   :  { %1827 = vmatmul.msk.f32.vlgmr.msrb.gmra.mxu1 %vm105_vm0, %v2447_v56  ;;  %900 = vmatpush.msrb.mxu2 %v668_v10  ;;  %v1222_v10 = vld [vmem:[%s3458_s6 + $0x2b0] sm:$0xff] }
 0x26c   :  { %920 = vmatpush.msra.mxu3 %v669_v12  ;;  %1418 = vmatpush.msra.mxu1 %v1165_v51  ;;  %v1212_v12 = vld [vmem:[%s3458_s6 + $0x260] sm:$0xff]  ;;  %v1182_v51 = vld [vmem:[%s3458_s6 + $0x170] sm:$0xff] }
 0x26d   :  { %957 = vmatpush.msra.mxu2 %v719_v30  ;;  %v1137_v30 = vld [vmem:[%s3458_s6 + $0x8] sm:$0xff] }
 0x26e   :  { %977 = vmatpush.msrb.mxu3 %v720_v13  ;;  %1419 = vmatpush.msra.mxu1 %v1164_v28  ;;  %v1221_v13 = vld [vmem:[%s3458_s6 + $0x2a8] sm:$0xff] }
 0x26f   :  { %958 = vmatpush.msra.mxu2 %v703_v17  ;;  %v1136_v17 = vld [vmem:[%s3458_s6] sm:$0xff]  ;;  %v1217_v28 = vld [vmem:[%s3458_s6 + $0x288] sm:$0xff] }
 0x270   :  { %978 = vmatpush.msrb.mxu3 %v704_v19  ;;  %1420 = vmatpush.msra.mxu1 %v1163_v29  ;;  %v1220_v19 = vld [vmem:[%s3458_s6 + $0x2a0] sm:$0xff] }
 0x271   :  { %959 = vmatpush.msra.mxu2 %v687_v41  ;;  %v1210_v41 = vld [vmem:[%s3458_s6 + $0x250] sm:$0xff]  ;;  %v1216_v29 = vld [vmem:[%s3458_s6 + $0x280] sm:$0xff] }
 0x272   :  { %979 = vmatpush.msrb.mxu3 %v688_v21  ;;  %1819 = vmatmul.msk.f32.vlgmr.msrb.gmra.mxu2 %vm105_vm0, %v2447_v56  ;;  %v1219_v21 = vld [vmem:[%s3458_s6 + $0x298] sm:$0xff] }
 0x273   :  { %1820 = vmatmul.msk.f32.vlgmr.msra.gmra.mxu3 %vm105_vm0, %v2447_v56  ;;  %960 = vmatpush.msra.mxu2 %v671_v22  ;;  %v1209_v22 = vld [vmem:[%s3458_s6 + $0x248] sm:$0xff] }
 0x274   :  { %980 = vmatpush.msrb.mxu3 %v672_v23  ;;  %1421 = vmatpush.msra.mxu1 %v1162_v14  ;;  %v1218_v23 = vld [vmem:[%s3458_s6 + $0x290] sm:$0xff] }
 0x275   :  { %1017 = vmatpush.msrb.mxu2 %v722_v24  ;;  %v1181_v24 = vld [vmem:[%s3458_s6 + $0x168] sm:$0xff]  ;;  %v1206_v14 = vld [vmem:[%s3458_s6 + $0x230] sm:$0xff] }
 0x276   :  { %1037 = vmatpush.msra.mxu3 %v723_v26  ;;  %1422 = vmatpush.msra.mxu1 %v1161_v38  ;;  %v1208_v26 = vld [vmem:[%s3458_s6 + $0x240] sm:$0xff]  ;;  %v1277_v38 = vld [vmem:[%s3458_s6 + $0x468] sm:$0xff] }
 0x277   :  { %1018 = vmatpush.msrb.mxu2 %v706_v31  ;;  %v1180_v31 = vld [vmem:[%s3458_s6 + $0x160] sm:$0xff] }
 0x278   :  { %1038 = vmatpush.msra.mxu3 %v707_v15  ;;  %1423 = vmatpush.msra.mxu1 %v1160_v5  ;;  %v1207_v15 = vld [vmem:[%s3458_s6 + $0x238] sm:$0xff]  ;;  %v1174_v5 = vld [vmem:[%s3458_s6 + $0x130] sm:$0xff] }
 0x279   :  { %1019 = vmatpush.msrb.mxu2 %v690_v18  ;;  %v1179_v18 = vld [vmem:[%s3458_s6 + $0x158] sm:$0xff] }
 0x27a   :  { %1039 = vmatpush.msra.mxu3 %v691_v32  ;;  %1822 = vmatmul.msk.f32.vlgmr.msra.gmra.mxu2 %vm105_vm0, %v2447_v56  ;;  %v1279_v32 = vld [vmem:[%s3458_s6 + $0x478] sm:$0xff] }
 0x27b   :  { %1823 = vmatmul.msk.f32.vlgmr.msrb.gmra.mxu3 %vm105_vm0, %v2447_v56  ;;  %1020 = vmatpush.msrb.mxu2 %v674_v34  ;;  %v1178_v34 = vld [vmem:[%s3458_s6 + $0x150] sm:$0xff] }
 0x27c   :  { %1040 = vmatpush.msra.mxu3 %v675_v35  ;;  %1424 = vmatpush.msra.mxu1 %v1159_v45  ;;  %v1278_v35 = vld [vmem:[%s3458_s6 + $0x470] sm:$0xff]  ;;  %v1204_v45 = vld [vmem:[%s3458_s6 + $0x220] sm:$0xff] }
 0x27d   :  { %1077 = vmatpush.msra.mxu2 %v725_v36  ;;  %v1205_v36 = vld [vmem:[%s3458_s6 + $0x228] sm:$0xff] }
 0x27e   :  { %1396 = vmatpush.msrb.mxu3 %v1151_v8  ;;  %1425 = vmatpush.msra.mxu1 %v1158_v59  ;;  %v1177_v8 = vld [vmem:[%s3458_s6 + $0x148] sm:$0xff]  ;;  %v1275_v59 = vld [vmem:[%s3458_s6 + $0x458] sm:$0xff] }
 0x27f   :  { %1078 = vmatpush.msra.mxu2 %v709_v39  ;;  %v1176_v39 = vld [vmem:[%s3458_s6 + $0x140] sm:$0xff] }
 0x280   :  { %1397 = vmatpush.msrb.mxu3 %v1150_v40  ;;  %1426 = vmatpush.msra.mxu1 %v1157_v55  ;;  %v1175_v40 = vld [vmem:[%s3458_s6 + $0x138] sm:$0xff]  ;;  %v1274_v55 = vld [vmem:[%s3458_s6 + $0x450] sm:$0xff] }
 0x281   :  { %1079 = vmatpush.msra.mxu2 %v693_v43  ;;  %v1173_v43 = vld [vmem:[%s3458_s6 + $0x128] sm:$0xff] }
 0x282   :  { %1398 = vmatpush.msrb.mxu3 %v1149_v2  ;;  %1825 = vmatmul.msk.f32.vlgmr.msrb.gmra.mxu2 %vm105_vm0, %v2447_v56  ;;  %v1172_v2 = vld [vmem:[%s3458_s6 + $0x120] sm:$0xff] }
 0x283   :  { %1826 = vmatmul.msk.f32.vlgmr.msra.gmra.mxu3 %vm105_vm0, %v2447_v56  ;;  %1080 = vmatpush.msra.mxu2 %v677_v46  ;;  %v1276_v46 = vld [vmem:[%s3458_s6 + $0x460] sm:$0xff] }
 0x284   :  { %1399 = vmatpush.msrb.mxu3 %v1148_v63  ;;  %1427 = vmatpush.msra.mxu1 %v1156_v25  ;;  %v1171_v63 = vld [vmem:[%s3458_s6 + $0x118] sm:$0xff]  ;;  %v1273_v25 = vld [vmem:[%s3458_s6 + $0x448] sm:$0xff] }
 0x285   :  { %1496 = vmatpush.msrb.mxu2 %v1231_v49  ;;  %v1203_v49 = vld [vmem:[%s3458_s6 + $0x218] sm:$0xff] }
 0x286   :  { %1400 = vmatpush.msrb.mxu3 %v1147_v52  ;;  %1428 = vmatpush.msra.mxu1 %v1155_v7  ;;  %v1170_v52 = vld [vmem:[%s3458_s6 + $0x110] sm:$0xff]  ;;  %v1200_v7 = vld [vmem:[%s3458_s6 + $0x200] sm:$0xff] }
 0x287   :  { %1497 = vmatpush.msrb.mxu2 %v1230_v48  ;;  %v1202_v48 = vld [vmem:[%s3458_s6 + $0x210] sm:$0xff] }
 0x288   :  { %1401 = vmatpush.msrb.mxu3 %v1146_v11  ;;  %1429 = vmatpush.msra.mxu1 %v1154_v58  ;;  %v1169_v11 = vld [vmem:[%s3458_s6 + $0x108] sm:$0xff]  ;;  %v1270_v58 = vld [vmem:[%s3458_s6 + $0x430] sm:$0xff] }
 0x289   :  { %1498 = vmatpush.msrb.mxu2 %v1229_v53  ;;  %v1201_v53 = vld [vmem:[%s3458_s6 + $0x208] sm:$0xff] }
 0x28a   :  { %1402 = vmatpush.msrb.mxu3 %v1145_v54  ;;  %1828 = vmatmul.msk.f32.vlgmr.msra.gmra.mxu2 %vm105_vm0, %v2447_v56  ;;  %v1226_v56 = vld [vmem:[%s3458_s6 + $0x2d0] sm:$0xff]  ;;  %v1168_v54 = vld [vmem:[%s3458_s6 + $0x100] sm:$0xff] }
 0x28b   :  { %1499 = vmatpush.msrb.mxu2 %v1228_v57  ;;  %1430 = vmatpush.msra.mxu1 %v1153_v42  ;;  %v1271_v57 = vld [vmem:[%s3458_s6 + $0x438] sm:$0xff] }
 0x28c   :  { %1403 = vmatpush.msrb.mxu3 %v1144_v50  ;;  %v1272_v50 = vld [vmem:[%s3458_s6 + $0x440] sm:$0xff]  ;;  %v1267_v42 = vld [vmem:[%s3458_s6 + $0x418] sm:$0xff] }
 0x28d   :  { %1500 = vmatpush.msrb.mxu2 %v1227_v60  ;;  %1431 = vmatpush.msra.mxu1 %v1152_v44  ;;  %v1268_v60 = vld [vmem:[%s3458_s6 + $0x420] sm:$0xff] }
 0x28e   :  { %1404 = vmatpush.msrb.mxu3 %v1143_v47  ;;  %v1269_v47 = vld [vmem:[%s3458_s6 + $0x428] sm:$0xff]  ;;  %v1264_v44 = vld [vmem:[%s3458_s6 + $0x400] sm:$0xff] }
 0x28f   :  { %1501 = vmatpush.msrb.mxu2 %v1226_v56  ;;  %1476 = vmatpush.msrb.mxu1 %v1215_v0  ;;  %v1265_v56 = vld [vmem:[%s3458_s6 + $0x408] sm:$0xff] }
 0x290   :  { %1405 = vmatpush.msrb.mxu3 %v1142_v61  ;;  %v1266_v61 = vld [vmem:[%s3458_s6 + $0x410] sm:$0xff] }
 0x291   :  { %1502 = vmatpush.msrb.mxu2 %v1225_v62  ;;  %1477 = vmatpush.msrb.mxu1 %v1214_v4 }
 0x292   :  { %1406 = vmatpush.msrb.mxu3 %v1141_v27  ;;  %v2892_v27 = vld [vmem:[%s3457_s5] sm:$0xff] }
 0x293   :  { %1503 = vmatpush.msrb.mxu2 %v1224_v3  ;;  %1478 = vmatpush.msrb.mxu1 %v1213_v9  ;;  %v730_v62 = vperm.slane %v2892_v27, 0  ;;  %v731_v0 = vperm.slane %v2892_v27, 1  ;;  %v1263_v9 = vld [vmem:[%s3458_s6 + $0x3f8] sm:$0xff] }
 0x294   :  { %1407 = vmatpush.msrb.mxu3 %v1140_v1 }
 0x295   :  { %1504 = vmatpush.msrb.mxu2 %v1223_v6  ;;  %1479 = vmatpush.msrb.mxu1 %v1212_v12  ;;  %v1199_v6 = vld [vmem:[%s3458_s6 + $0x1f8] sm:$0xff]  ;;  %v1197_v12 = vld [vmem:[%s3458_s6 + $0x1e8] sm:$0xff] }
 0x296   :  { %1408 = vmatpush.msrb.mxu3 %v1139_v37 }
 0x297   :  { %1505 = vmatpush.msrb.mxu2 %v1222_v10  ;;  %1480 = vmatpush.msrb.mxu1 %v1211_v16  ;;  %v1262_v10 = vld [vmem:[%s3458_s6 + $0x3f0] sm:$0xff]  ;;  %v733_v16 = vperm.slane %v2892_v27, 3 }
 0x298   :  { %1409 = vmatpush.msrb.mxu3 %v1138_v33  ;;  %v1198_v33 = vld [vmem:[%s3458_s6 + $0x1f0] sm:$0xff] }
 0x299   :  { %1506 = vmatpush.msrb.mxu2 %v1221_v13  ;;  %1481 = vmatpush.msrb.mxu1 %v1210_v41  ;;  %v732_v13 = vperm.slane %v2892_v27, 2 }
 0x29a   :  { %1410 = vmatpush.msrb.mxu3 %v1137_v30  ;;  %v1261_v30 = vld [vmem:[%s3458_s6 + $0x3e8] sm:$0xff] }
 0x29b   :  { %1507 = vmatpush.msrb.mxu2 %v1220_v19  ;;  %1482 = vmatpush.msrb.mxu1 %v1209_v22  ;;  %v1260_v19 = vld [vmem:[%s3458_s6 + $0x3e0] sm:$0xff] }
 0x29c   :  { %1411 = vmatpush.msrb.mxu3 %v1136_v17  ;;  %v1196_v17 = vld [vmem:[%s3458_s6 + $0x1e0] sm:$0xff] }
 0x29d   :  { %1508 = vmatpush.msrb.mxu2 %v1219_v21  ;;  %1483 = vmatpush.msrb.mxu1 %v1208_v26 }
 0x29e   :  { %1436 = vmatpush.msra.mxu3 %v1183_v20 }
 0x29f   :  { %1509 = vmatpush.msrb.mxu2 %v1218_v23  ;;  %1484 = vmatpush.msrb.mxu1 %v1207_v15  ;;  %v1195_v23 = vld [vmem:[%s3458_s6 + $0x1d8] sm:$0xff]  ;;  %v1258_v15 = vld [vmem:[%s3458_s6 + $0x3d0] sm:$0xff] }
 0x2a0   :  { %1437 = vmatpush.msra.mxu3 %v1182_v51 }
 0x2a1   :  { %1510 = vmatpush.msrb.mxu2 %v1217_v28  ;;  %1485 = vmatpush.msrb.mxu1 %v1206_v14  ;;  %v1257_v14 = vld [vmem:[%s3458_s6 + $0x3c8] sm:$0xff] }
 0x2a2   :  { %1438 = vmatpush.msra.mxu3 %v1181_v24  ;;  %v1259_v24 = vld [vmem:[%s3458_s6 + $0x3d8] sm:$0xff] }
 0x2a3   :  { %1511 = vmatpush.msrb.mxu2 %v1216_v29  ;;  %1486 = vmatpush.msrb.mxu1 %v1205_v36 }
 0x2a4   :  { %1439 = vmatpush.msra.mxu3 %v1180_v31  ;;  %v1194_v31 = vld [vmem:[%s3458_s6 + $0x1d0] sm:$0xff] }
 0x2a5   :  { %1556 = vmatpush.msra.mxu2 %v1279_v32  ;;  %1487 = vmatpush.msrb.mxu1 %v1204_v45  ;;  %v1193_v32 = vld [vmem:[%s3458_s6 + $0x1c8] sm:$0xff]  ;;  %v1255_v45 = vld [vmem:[%s3458_s6 + $0x3b8] sm:$0xff] }
 0x2a6   :  { %1440 = vmatpush.msra.mxu3 %v1179_v18 }
 0x2a7   :  { %1557 = vmatpush.msra.mxu2 %v1278_v35  ;;  %1488 = vmatpush.msrb.mxu1 %v1203_v49  ;;  %v735_v35 = vperm.slane %v2892_v27, 5  ;;  %v1190_v49 = vld [vmem:[%s3458_s6 + $0x1b0] sm:$0xff] }
 0x2a8   :  { %1441 = vmatpush.msra.mxu3 %v1178_v34  ;;  %v734_v34 = vperm.slane %v2892_v27, 4 }
 0x2a9   :  { %1558 = vmatpush.msra.mxu2 %v1277_v38  ;;  %1489 = vmatpush.msrb.mxu1 %v1202_v48  ;;  %v1256_v38 = vld [vmem:[%s3458_s6 + $0x3c0] sm:$0xff]  ;;  %v1326_v48 = vld [vmem:[%s3458_s6 + $0x5f0] sm:$0xff] }
 0x2aa   :  { %1442 = vmatpush.msra.mxu3 %v1177_v8  ;;  %v1192_v8 = vld [vmem:[%s3458_s6 + $0x1c0] sm:$0xff] }
 0x2ab   :  { %1559 = vmatpush.msra.mxu2 %v1276_v46  ;;  %1490 = vmatpush.msrb.mxu1 %v1201_v53  ;;  %v736_v53 = vperm.slane %v2892_v27, 6 }
 0x2ac   :  { %1443 = vmatpush.msra.mxu3 %v1176_v39 }
 0x2ad   :  { %1560 = vmatpush.msra.mxu2 %v1275_v59  ;;  %1491 = vmatpush.msrb.mxu1 %v1200_v7  ;;  %v1254_v59 = vld [vmem:[%s3458_s6 + $0x3b0] sm:$0xff] }
 0x2ae   :  { %1444 = vmatpush.msra.mxu3 %v1175_v40 }
 0x2af   :  { %1561 = vmatpush.msra.mxu2 %v1274_v55  ;;  %v1189_v55 = vld [vmem:[%s3458_s6 + $0x1a8] sm:$0xff] }
 0x2b0   :  { %1445 = vmatpush.msra.mxu3 %v1174_v5 }
 0x2b1   :  { %1562 = vmatpush.msra.mxu2 %v1273_v25  ;;  %v737_v25 = vperm.slane %v2892_v27, 7  ;;  %v1251_v27 = vld [vmem:[%s3458_s6 + $0x398] sm:$0xff] }
 0x2b2   :  { %1446 = vmatpush.msra.mxu3 %v1173_v43 }
 0x2b3   :  { %1563 = vmatpush.msra.mxu2 %v1272_v50  ;;  %v1188_v50 = vld [vmem:[%s3458_s6 + $0x1a0] sm:$0xff] }
 0x2b4   :  { %1447 = vmatpush.msra.mxu3 %v1172_v2  ;;  %v1191_v2 = vld [vmem:[%s3458_s6 + $0x1b8] sm:$0xff] }
 0x2b5   :  { %1564 = vmatpush.msra.mxu2 %v1271_v57  ;;  %v1252_v57 = vld [vmem:[%s3458_s6 + $0x3a0] sm:$0xff] }
 0x2b6   :  { %1448 = vmatpush.msra.mxu3 %v1171_v63  ;;  %v1327_v63 = vld [vmem:[%s3458_s6 + $0x5f8] sm:$0xff] }
 0x2b7   :  { %1565 = vmatpush.msra.mxu2 %v1270_v58 }
 0x2b8   :  { %1449 = vmatpush.msra.mxu3 %v1170_v52  ;;  %v2972_v52 = vld [vmem:[%s3457_s5 + $0x8] sm:$0xff] }
 0x2b9   :  { %1566 = vmatpush.msra.mxu2 %v1269_v47  ;;  %v738_v7 = vperm.slane %v2972_v52, 0 }
 0x2ba   :  { %1450 = vmatpush.msra.mxu3 %v1169_v11  ;;  %v1253_v11 = vld [vmem:[%s3458_s6 + $0x3a8] sm:$0xff] }
 0x2bb   :  { %1567 = vmatpush.msra.mxu2 %v1268_v60  ;;  %v1324_v60 = vld [vmem:[%s3458_s6 + $0x5e0] sm:$0xff] }
 0x2bc   :  { %1451 = vmatpush.msra.mxu3 %v1168_v54  ;;  %v1325_v54 = vld [vmem:[%s3458_s6 + $0x5e8] sm:$0xff] }
 0x2bd   :  { %1568 = vmatpush.msra.mxu2 %v1267_v42 }
 0x2bf   :  { %1569 = vmatpush.msra.mxu2 %v1266_v61 }
 0x2c1   :  { %1570 = vmatpush.msra.mxu2 %v1265_v56 }
 0x2c3   :  { %1571 = vmatpush.msra.mxu2 %v1264_v44  ;;  %v1187_v44 = vld [vmem:[%s3458_s6 + $0x198] sm:$0xff] }
 0x2d8   :  { %v942_v46 = vpop.f32.mrf.mxu1 }
 0x2dd   :  { %v782_v1 = vpop.f32.mrf.mxu2  ;;  %v802_v3 = vpop.f32.mrf.mxu3 }
 0x2de   :  { %v783_v4 = vadd.f32 %v782_v1, %v730_v62  ;;  %v803_v37 = vadd.f32 %v802_v3, %v731_v0  ;;  %v943_v62 = vadd.f32 %v942_v46, %v738_v7  ;;  %v741_v0 = vperm.slane %v2972_v52, 3 }
 0x2df   :  { %v743_v46 = vperm.slane %v2972_v52, 5 }
 0x2e0   :  { %1412 = vmatmul.f32.vlgmr.msrb.gmra.mxu3 %v783_v4  ;;  %1432 = vmatmul.f32.vlgmr.msra.gmra.mxu1 %v803_v37  ;;  %v1101_v21 = vrot.slane %v803_v37, 6  ;;  %v1186_v37 = vld [vmem:[%s3458_s6 + $0x190] sm:$0xff] }
 0x2e1   :  { %1456 = vmatpush.msrb.mxu3 %v1199_v6  ;;  %1536 = vmatpush.msra.mxu1 %v1263_v9  ;;  %v1002_v6 = vpop.f32.mrf.mxu1  ;;  %v1250_v9 = vld [vmem:[%s3458_s6 + $0x390] sm:$0xff] }
 0x2e2   :  { %v1114_v29 = vsel %vm1113_vm1, %v783_v4, %v1101_v21  ;;  %v1323_v4 = vld [vmem:[%s3458_s6 + $0x5d8] sm:$0xff]  ;;  %v1184_v21 = vld [vmem:[%s3458_s6 + $0x180] sm:$0xff] }
 0x2e3   :  { %1457 = vmatpush.msrb.mxu3 %v1198_v33  ;;  %1537 = vmatpush.msra.mxu1 %v1262_v10 }
 0x2e5   :  { %1458 = vmatpush.msrb.mxu3 %v1197_v12  ;;  %1538 = vmatpush.msra.mxu1 %v1261_v30  ;;  %v822_v20 = vpop.f32.mrf.mxu2  ;;  %v842_v41 = vpop.f32.mrf.mxu3  ;;  %v1322_v12 = vld [vmem:[%s3458_s6 + $0x5d0] sm:$0xff]  ;;  %v1185_v30 = vld [vmem:[%s3458_s6 + $0x188] sm:$0xff] }
 0x2e6   :  { %v823_v51 = vadd.f32 %v822_v20, %v732_v13  ;;  %v2922_v22 = vadd.f32 %v842_v41, %v733_v16  ;;  %v739_v13 = vperm.slane %v2972_v52, 1  ;;  %v740_v16 = vperm.slane %v2972_v52, 2  ;;  %v1321_v41 = vld [vmem:[%s3458_s6 + $0x5c8] sm:$0xff] }
 0x2e7   :  { %1459 = vmatpush.msrb.mxu3 %v1196_v17  ;;  %1539 = vmatpush.msra.mxu1 %v1260_v19  ;;  %v1249_v17 = vld [vmem:[%s3458_s6 + $0x388] sm:$0xff]  ;;  %v3031_v20 = vadd.f32 %v1002_v6, %v741_v0 }
 0x2e8   :  { %v1102_v26 = vrot.slane %v823_v51, 4  ;;  %v1103_v28 = vrot.slane %v2922_v22, 2  ;;  %1452 = vmatmul.f32.vlgmr.msra.gmra.mxu3 %v823_v51 }
 0x2e9   :  { %1460 = vmatpush.msrb.mxu3 %v1195_v23  ;;  %1540 = vmatpush.msra.mxu1 %v1259_v24  ;;  %v1248_v24 = vld [vmem:[%s3458_s6 + $0x380] sm:$0xff] }
 0x2ea   :  { %v1116_v18 = vsel %vm1115_vm2, %v1102_v26, %v1103_v28 }
 0x2eb   :  { %1461 = vmatpush.msrb.mxu3 %v1194_v31  ;;  %1541 = vmatpush.msra.mxu1 %v1258_v15  ;;  %v1118_v36 = vsel %vm1117_vm3, %v1114_v29, %v1116_v18  ;;  %v1320_v31 = vld [vmem:[%s3458_s6 + $0x5c0] sm:$0xff]  ;;  %v1247_v15 = vld [vmem:[%s3458_s6 + $0x378] sm:$0xff]  ;;  %v1109_v29 = vrot.slane %v3031_v20, 2 }
 0x2ec   :  { %1132 = vst [vmem:[#allocation2] sm:$0xff] %v1118_v36 }
 0x2ed   :  { %1462 = vmatpush.msrb.mxu3 %v1193_v32  ;;  %1542 = vmatpush.msra.mxu1 %v1257_v14  ;;  %v862_v39 = vpop.f32.mrf.mxu2  ;;  %v882_v40 = vpop.f32.mrf.mxu3  ;;  %v1311_v14 = vld [vmem:[%s3458_s6 + $0x578] sm:$0xff] }
 0x2ee   :  { %v863_v5 = vadd.f32 %v862_v39, %v734_v34  ;;  %v883_v43 = vadd.f32 %v882_v40, %v735_v35  ;;  %v1319_v34 = vld [vmem:[%s3458_s6 + $0x5b8] sm:$0xff]  ;;  %v1246_v35 = vld [vmem:[%s3458_s6 + $0x370] sm:$0xff]  ;;  %v1245_v39 = vld [vmem:[%s3458_s6 + $0x368] sm:$0xff] }
 0x2ef   :  { %1463 = vmatpush.msrb.mxu3 %v1192_v8  ;;  %1543 = vmatpush.msra.mxu1 %v1256_v38  ;;  %v1318_v38 = vld [vmem:[%s3458_s6 + $0x5b0] sm:$0xff] }
 0x2f0   :  { %1492 = vmatmul.f32.vlgmr.msrb.gmra.mxu1 %v863_v5  ;;  %1512 = vmatmul.f32.vlgmr.msrb.gmra.mxu2 %v883_v43  ;;  %v1104_v42 = vrot.slane %v883_v43, 6  ;;  %v1317_v43 = vld [vmem:[%s3458_s6 + $0x5a8] sm:$0xff] }
 0x2f1   :  { %1464 = vmatpush.msrb.mxu3 %v1191_v2  ;;  %1544 = vmatpush.msra.mxu1 %v1255_v45  ;;  %v1244_v45 = vld [vmem:[%s3458_s6 + $0x360] sm:$0xff] }
 0x2f2   :  { %1616 = vmatpush.msrb.mxu2 %v1327_v63  ;;  %v1119_v33 = vsel %vm1113_vm1, %v863_v5, %v1104_v42  ;;  %v1309_v5 = vld [vmem:[%s3458_s6 + $0x568] sm:$0xff]  ;;  %v1308_v63 = vld [vmem:[%s3458_s6 + $0x560] sm:$0xff]  ;;  %v742_v42 = vperm.slane %v2972_v52, 4 }
 0x2f3   :  { %1465 = vmatpush.msrb.mxu3 %v1190_v49  ;;  %1545 = vmatpush.msra.mxu1 %v1254_v59  ;;  %v1316_v49 = vld [vmem:[%s3458_s6 + $0x5a0] sm:$0xff] }
 0x2f4   :  { %1617 = vmatpush.msrb.mxu2 %v1326_v48  ;;  %v1243_v48 = vld [vmem:[%s3458_s6 + $0x358] sm:$0xff] }
 0x2f5   :  { %1466 = vmatpush.msrb.mxu3 %v1189_v55  ;;  %1546 = vmatpush.msra.mxu1 %v1253_v11  ;;  %v902_v58 = vpop.f32.mrf.mxu2  ;;  %v744_v55 = vperm.slane %v2972_v52, 6  ;;  %v1307_v11 = vld [vmem:[%s3458_s6 + $0x558] sm:$0xff] }
 0x2f6   :  { %v922_v47 = vpop.f32.mrf.mxu3  ;;  %1618 = vmatpush.msrb.mxu2 %v1325_v54  ;;  %v2998_v61 = vadd.f32 %v902_v58, %v736_v53  ;;  %v1315_v53 = vld [vmem:[%s3458_s6 + $0x598] sm:$0xff]  ;;  %v1242_v54 = vld [vmem:[%s3458_s6 + $0x350] sm:$0xff]  ;;  %v745_v58 = vperm.slane %v2972_v52, 7 }
 0x2f7   :  { %v923_v56 = vadd.f32 %v922_v47, %v737_v25  ;;  %1467 = vmatpush.msrb.mxu3 %v1188_v50  ;;  %1547 = vmatpush.msra.mxu1 %v1252_v57  ;;  %v1062_v25 = vpop.f32.mrf.mxu1  ;;  %v1306_v50 = vld [vmem:[%s3458_s6 + $0x550] sm:$0xff]  ;;  %v1241_v47 = vld [vmem:[%s3458_s6 + $0x348] sm:$0xff] }
 0x2f8   :  { %v1105_v1 = vrot.slane %v2998_v61, 4  ;;  %1619 = vmatpush.msrb.mxu2 %v1324_v60  ;;  %v1314_v57 = vld [vmem:[%s3458_s6 + $0x590] sm:$0xff]  ;;  %v3118_v60 = vadd.f32 %v1062_v25, %v744_v55  ;;  %v1355_v55 = vld [vmem:[%s3458_s6 + $0x6d8] sm:$0xff] }
 0x2f9   :  { %v1106_v3 = vrot.slane %v923_v56, 2  ;;  %1468 = vmatpush.msrb.mxu3 %v1187_v44  ;;  %1548 = vmatpush.msra.mxu1 %v1251_v27  ;;  %v1313_v44 = vld [vmem:[%s3458_s6 + $0x588] sm:$0xff]  ;;  %v1354_v25 = vld [vmem:[%s3458_s6 + $0x6d0] sm:$0xff] }
 0x2fa   :  { %1572 = vmatmul.f32.vlgmr.msra.gmra.mxu2 %v943_v62 }
 0x2fb   :  { %v1120_v10 = vsel %vm1115_vm2, %v1105_v1, %v1106_v3  ;;  %1620 = vmatpush.msrb.mxu2 %v1323_v4  ;;  %1469 = vmatpush.msrb.mxu3 %v1186_v37  ;;  %v1304_v1 = vld [vmem:[%s3458_s6 + $0x540] sm:$0xff]  ;;  %v1239_v4 = vld [vmem:[%s3458_s6 + $0x338] sm:$0xff]  ;;  %v1111_v37 = vrot.slane %v3118_v60, 4 }
 0x2fc   :  { %v1121_v19 = vsel %vm1117_vm3, %v1119_v33, %v1120_v10  ;;  %1549 = vmatpush.msra.mxu1 %v1250_v9  ;;  %v1312_v3 = vld [vmem:[%s3458_s6 + $0x580] sm:$0xff]  ;;  %v1303_v33 = vld [vmem:[%s3458_s6 + $0x538] sm:$0xff] }
 0x2fd   :  { %1133 = vst [vmem:[#allocation2 + $0x8] sm:$0xff] %v1121_v19  ;;  %1621 = vmatpush.msrb.mxu2 %v1322_v12  ;;  %1470 = vmatpush.msrb.mxu3 %v1185_v30  ;;  %v962_v51 = vpop.f32.mrf.mxu2  ;;  %v1375_v10 = vld [vmem:[%s3458_s6 + $0x778] sm:$0xff]  ;;  %v1238_v12 = vld [vmem:[%s3458_s6 + $0x330] sm:$0xff]  ;;  %v1237_v19 = vld [vmem:[%s3458_s6 + $0x328] sm:$0xff] }
 0x2fe   :  { %v982_v23 = vpop.f32.mrf.mxu3  ;;  %1550 = vmatpush.msra.mxu1 %v1249_v17  ;;  %v3042_v26 = vadd.f32 %v962_v51, %v739_v13  ;;  %v1374_v17 = vld [vmem:[%s3458_s6 + $0x770] sm:$0xff]  ;;  %v1236_v51 = vld [vmem:[%s3458_s6 + $0x320] sm:$0xff] }
 0x2ff   :  { %v3044_v28 = vadd.f32 %v982_v23, %v740_v16  ;;  %1622 = vmatpush.msrb.mxu2 %v1321_v41  ;;  %1471 = vmatpush.msrb.mxu3 %v1184_v21  ;;  %v1302_v16 = vld [vmem:[%s3458_s6 + $0x530] sm:$0xff]  ;;  %v1373_v21 = vld [vmem:[%s3458_s6 + $0x768] sm:$0xff]  ;;  %v1300_v23 = vld [vmem:[%s3458_s6 + $0x520] sm:$0xff] }
 0x300   :  { %v1107_v18 = vrot.slane %v3042_v26, 6  ;;  %1551 = vmatpush.msra.mxu1 %v1248_v24  ;;  %1472 = vmatmul.f32.vlgmr.msrb.gmra.mxu3 %v2922_v22  ;;  %v1310_v22 = vld [vmem:[%s3458_s6 + $0x570] sm:$0xff]  ;;  %v1372_v24 = vld [vmem:[%s3458_s6 + $0x760] sm:$0xff] }
 0x301   :  { %v1108_v32 = vrot.slane %v3044_v28, 4  ;;  %1623 = vmatpush.msrb.mxu2 %v1320_v31  ;;  %1516 = vmatpush.msra.mxu3 %v1247_v15  ;;  %v1235_v31 = vld [vmem:[%s3458_s6 + $0x318] sm:$0xff] }
 0x302   :  { %v1122_v36 = vsel %vm1113_vm1, %v943_v62, %v1107_v18  ;;  %1552 = vmatmul.f32.vlgmr.msra.gmra.mxu1 %v923_v56  ;;  %v1305_v56 = vld [vmem:[%s3458_s6 + $0x548] sm:$0xff]  ;;  %v1240_v62 = vld [vmem:[%s3458_s6 + $0x340] sm:$0xff]  ;;  %v1299_v15 = vld [vmem:[%s3458_s6 + $0x518] sm:$0xff] }
 0x303   :  { %v1123_v8 = vsel %vm1115_vm2, %v1108_v32, %v1109_v29  ;;  %1596 = vmatpush.msrb.mxu1 %v1311_v14  ;;  %1624 = vmatpush.msrb.mxu2 %v1319_v34  ;;  %v1371_v29 = vld [vmem:[%s3458_s6 + $0x758] sm:$0xff]  ;;  %v1234_v18 = vld [vmem:[%s3458_s6 + $0x310] sm:$0xff]  ;;  %v1233_v34 = vld [vmem:[%s3458_s6 + $0x308] sm:$0xff] }
 0x304   :  { %v1124_v40 = vsel %vm1117_vm3, %v1122_v36, %v1123_v8  ;;  %1517 = vmatpush.msra.mxu3 %v1246_v35  ;;  %v1298_v32 = vld [vmem:[%s3458_s6 + $0x510] sm:$0xff]  ;;  %v1297_v35 = vld [vmem:[%s3458_s6 + $0x508] sm:$0xff]  ;;  %v1232_v8 = vld [vmem:[%s3458_s6 + $0x300] sm:$0xff] }
 0x305   :  { %1134 = vst [vmem:[#allocation2 + $0x10] sm:$0xff] %v1124_v40  ;;  %1597 = vmatpush.msrb.mxu1 %v1310_v22  ;;  %1625 = vmatpush.msrb.mxu2 %v1318_v38  ;;  %v1022_v2 = vpop.f32.mrf.mxu2  ;;  %v1370_v14 = vld [vmem:[%s3458_s6 + $0x750] sm:$0xff]  ;;  %v1369_v36 = vld [vmem:[%s3458_s6 + $0x748] sm:$0xff]  ;;  %v1296_v22 = vld [vmem:[%s3458_s6 + $0x500] sm:$0xff] }
 0x306   :  { %1518 = vmatpush.msra.mxu3 %v1245_v39  ;;  %v1042_v59 = vpop.f32.mrf.mxu3  ;;  %v3143_v6 = vadd.f32 %v1022_v2, %v742_v42  ;;  %v1368_v38 = vld [vmem:[%s3458_s6 + $0x740] sm:$0xff]  ;;  %v1295_v39 = vld [vmem:[%s3458_s6 + $0x4f8] sm:$0xff]  ;;  %v1358_v2 = vld [vmem:[%s3458_s6 + $0x6f0] sm:$0xff] }
 0x307   :  { %1598 = vmatpush.msrb.mxu1 %v1309_v5  ;;  %1626 = vmatpush.msrb.mxu2 %v1317_v43  ;;  %v3106_v7 = vadd.f32 %v1042_v59, %v743_v46  ;;  %v1359_v40 = vld [vmem:[%s3458_s6 + $0x6f8] sm:$0xff]  ;;  %v1294_v43 = vld [vmem:[%s3458_s6 + $0x4f0] sm:$0xff]  ;;  %v1365_v46 = vld [vmem:[%s3458_s6 + $0x728] sm:$0xff] }
 0x308   :  { %1519 = vmatpush.msra.mxu3 %v1244_v45  ;;  %v1367_v5 = vld [vmem:[%s3458_s6 + $0x738] sm:$0xff]  ;;  %v1366_v45 = vld [vmem:[%s3458_s6 + $0x730] sm:$0xff]  ;;  %v1364_v59 = vld [vmem:[%s3458_s6 + $0x720] sm:$0xff] }
 0x309   :  { %1599 = vmatpush.msrb.mxu1 %v1308_v63  ;;  %1627 = vmatpush.msrb.mxu2 %v1316_v49  ;;  %v1110_v0 = vrot.slane %v3106_v7, 6  ;;  %v1292_v63 = vld [vmem:[%s3458_s6 + $0x4e0] sm:$0xff] }
 0x30a   :  { %1520 = vmatpush.msra.mxu3 %v1243_v48  ;;  %v1356_v49 = vld [vmem:[%s3458_s6 + $0x6e0] sm:$0xff]  ;;  %v1291_v48 = vld [vmem:[%s3458_s6 + $0x4d8] sm:$0xff] }
 0x30b   :  { %1600 = vmatpush.msrb.mxu1 %v1307_v11  ;;  %1628 = vmatpush.msrb.mxu2 %v1315_v53  ;;  %v1125_v30 = vsel %vm1113_vm1, %v3143_v6, %v1110_v0  ;;  %v1363_v11 = vld [vmem:[%s3458_s6 + $0x718] sm:$0xff]  ;;  %v1290_v53 = vld [vmem:[%s3458_s6 + $0x4d0] sm:$0xff]  ;;  %v1352_v42 = vld [vmem:[%s3458_s6 + $0x6c0] sm:$0xff] }
 0x30c   :  { %1521 = vmatpush.msra.mxu3 %v1242_v54  ;;  %v1362_v54 = vld [vmem:[%s3458_s6 + $0x710] sm:$0xff] }
 0x30d   :  { %1601 = vmatpush.msrb.mxu1 %v1306_v50  ;;  %1629 = vmatpush.msrb.mxu2 %v1314_v57  ;;  %v1082_v27 = vpop.f32.mrf.mxu2  ;;  %v1289_v50 = vld [vmem:[%s3458_s6 + $0x4c8] sm:$0xff]  ;;  %v1350_v0 = vld [vmem:[%s3458_s6 + $0x6b0] sm:$0xff] }
 0x30e   :  { %1522 = vmatpush.msra.mxu3 %v1241_v47  ;;  %v3131_v52 = vadd.f32 %v1082_v27, %v745_v58  ;;  %v1353_v57 = vld [vmem:[%s3458_s6 + $0x6c8] sm:$0xff]  ;;  %v1288_v47 = vld [vmem:[%s3458_s6 + $0x4c0] sm:$0xff]  ;;  %v1351_v27 = vld [vmem:[%s3458_s6 + $0x6b8] sm:$0xff] }
 0x30f   :  { %1602 = vmatpush.msrb.mxu1 %v1305_v56  ;;  %1630 = vmatpush.msrb.mxu2 %v1313_v44  ;;  %v1361_v58 = vld [vmem:[%s3458_s6 + $0x708] sm:$0xff]  ;;  %v1360_v56 = vld [vmem:[%s3458_s6 + $0x700] sm:$0xff]  ;;  %v1287_v44 = vld [vmem:[%s3458_s6 + $0x4b8] sm:$0xff] }
 0x310   :  { %v1112_v9 = vrot.slane %v3131_v52, 2  ;;  %1523 = vmatpush.msra.mxu3 %v1240_v62  ;;  %v1286_v62 = vld [vmem:[%s3458_s6 + $0x4b0] sm:$0xff] }
 0x311   :  { %1603 = vmatpush.msrb.mxu1 %v1304_v1  ;;  %1631 = vmatpush.msrb.mxu2 %v1312_v3  ;;  %v1285_v1 = vld [vmem:[%s3458_s6 + $0x4a8] sm:$0xff] }
 0x312   :  { %v1126_v13 = vsel %vm1115_vm2, %v1111_v37, %v1112_v9  ;;  %1524 = vmatpush.msra.mxu3 %v1239_v4  ;;  %1632 = vmatmul.f32.vlgmr.msrb.gmra.mxu2 %v3031_v20  ;;  %v1301_v20 = vld [vmem:[%s3458_s6 + $0x528] sm:$0xff]  ;;  %v1284_v4 = vld [vmem:[%s3458_s6 + $0x4a0] sm:$0xff]  ;;  %v1347_v9 = vld [vmem:[%s3458_s6 + $0x698] sm:$0xff] }
 0x313   :  { %1604 = vmatpush.msrb.mxu1 %v1303_v33  ;;  %1676 = vmatpush.msra.mxu2 %v1375_v10  ;;  %v1127_v41 = vsel %vm1117_vm3, %v1125_v30, %v1126_v13  ;;  %v1349_v3 = vld [vmem:[%s3458_s6 + $0x6a8] sm:$0xff]  ;;  %v1348_v37 = vld [vmem:[%s3458_s6 + $0x6a0] sm:$0xff]  ;;  %v1282_v33 = vld [vmem:[%s3458_s6 + $0x490] sm:$0xff] }
 0x314   :  { %1525 = vmatpush.msra.mxu3 %v1238_v12  ;;  %1135 = vst [vmem:[#allocation2 + $0x18] sm:$0xff] %v1127_v41  ;;  %v1346_v10 = vld [vmem:[%s3458_s6 + $0x690] sm:$0xff]  ;;  %v1281_v12 = vld [vmem:[%s3458_s6 + $0x488] sm:$0xff]  ;;  %v1280_v13 = vld [vmem:[%s3458_s6 + $0x480] sm:$0xff] }
 0x315   :  { %1605 = vmatpush.msrb.mxu1 %v1302_v16  ;;  %1677 = vmatpush.msra.mxu2 %v1374_v17  ;;  %v1345_v30 = vld [vmem:[%s3458_s6 + $0x688] sm:$0xff]  ;;  %v1344_v16 = vld [vmem:[%s3458_s6 + $0x680] sm:$0xff]  ;;  %v1343_v17 = vld [vmem:[%s3458_s6 + $0x678] sm:$0xff]  ;;  %1727 = dma.vmem_to_hbm [thread:$0]  %s1723_s27, 512, %s1725_s30, [#allocation3]  }
 0x316   :  { %1526 = vmatpush.msra.mxu3 %v1237_v19  ;;  %v1342_v19 = vld [vmem:[%s3458_s6 + $0x670] sm:$0xff]  ;;  %v1341_v41 = vld [vmem:[%s3458_s6 + $0x668] sm:$0xff] }
 0x317   :  { %1606 = vmatpush.msrb.mxu1 %v1301_v20  ;;  %1678 = vmatpush.msra.mxu2 %v1373_v21  ;;  %v1340_v20 = vld [vmem:[%s3458_s6 + $0x660] sm:$0xff]  ;;  %v1337_v21 = vld [vmem:[%s3458_s6 + $0x648] sm:$0xff] }
 0x318   :  { %1527 = vmatpush.msra.mxu3 %v1236_v51  ;;  %v1336_v51 = vld [vmem:[%s3458_s6 + $0x640] sm:$0xff] }
 0x319   :  { %1607 = vmatpush.msrb.mxu1 %v1300_v23  ;;  %1679 = vmatpush.msra.mxu2 %v1372_v24  ;;  %v1335_v23 = vld [vmem:[%s3458_s6 + $0x638] sm:$0xff]  ;;  %v1334_v24 = vld [vmem:[%s3458_s6 + $0x630] sm:$0xff] }
 0x31a   :  { %1528 = vmatpush.msra.mxu3 %v1235_v31  ;;  %v1333_v31 = vld [vmem:[%s3458_s6 + $0x628] sm:$0xff] }
 0x31b   :  { %1608 = vmatpush.msrb.mxu1 %v1299_v15  ;;  %1680 = vmatpush.msra.mxu2 %v1371_v29  ;;  %v1332_v15 = vld [vmem:[%s3458_s6 + $0x620] sm:$0xff]  ;;  %v1331_v29 = vld [vmem:[%s3458_s6 + $0x618] sm:$0xff] }
 0x31c   :  { %1529 = vmatpush.msra.mxu3 %v1234_v18  ;;  %v1330_v18 = vld [vmem:[%s3458_s6 + $0x610] sm:$0xff] }
 0x31d   :  { %1609 = vmatpush.msrb.mxu1 %v1298_v32  ;;  %1681 = vmatpush.msra.mxu2 %v1370_v14  ;;  %v1329_v32 = vld [vmem:[%s3458_s6 + $0x608] sm:$0xff]  ;;  %v1328_v14 = vld [vmem:[%s3458_s6 + $0x600] sm:$0xff] }
 0x31e   :  { %1530 = vmatpush.msra.mxu3 %v1233_v34  ;;  %v1391_v34 = vld [vmem:[%s3458_s6 + $0x7f8] sm:$0xff] }
 0x31f   :  { %1610 = vmatpush.msrb.mxu1 %v1297_v35  ;;  %1682 = vmatpush.msra.mxu2 %v1369_v36  ;;  %v1390_v35 = vld [vmem:[%s3458_s6 + $0x7f0] sm:$0xff]  ;;  %v1389_v36 = vld [vmem:[%s3458_s6 + $0x7e8] sm:$0xff] }
 0x320   :  { %1531 = vmatpush.msra.mxu3 %v1232_v8  ;;  %v1388_v8 = vld [vmem:[%s3458_s6 + $0x7e0] sm:$0xff] }
 0x321   :  { %1611 = vmatpush.msrb.mxu1 %v1296_v22  ;;  %1683 = vmatpush.msra.mxu2 %v1368_v38  ;;  %v1387_v22 = vld [vmem:[%s3458_s6 + $0x7d8] sm:$0xff]  ;;  %v1385_v38 = vld [vmem:[%s3458_s6 + $0x7c8] sm:$0xff] }
 0x322   :  { %1532 = vmatmul.f32.vlgmr.msra.gmra.mxu3 %v2998_v61  ;;  %1612 = vmatmul.f32.vlgmr.msrb.gmra.mxu1 %v3044_v28  ;;  %v1293_v61 = vld [vmem:[%s3458_s6 + $0x4e8] sm:$0xff] }
 0x323   :  { %1576 = vmatpush.msrb.mxu3 %v1295_v39  ;;  %1656 = vmatpush.msra.mxu1 %v1359_v40  ;;  %v1357_v28 = vld [vmem:[%s3458_s6 + $0x6e8] sm:$0xff]  ;;  %v1384_v39 = vld [vmem:[%s3458_s6 + $0x7c0] sm:$0xff]  ;;  %v1383_v40 = vld [vmem:[%s3458_s6 + $0x7b8] sm:$0xff] }
 0x324   :  { %1684 = vmatpush.msra.mxu2 %v1367_v5  ;;  %v1382_v5 = vld [vmem:[%s3458_s6 + $0x7b0] sm:$0xff] }
 0x325   :  { %1577 = vmatpush.msrb.mxu3 %v1294_v43  ;;  %1657 = vmatpush.msra.mxu1 %v1358_v2  ;;  %v1381_v43 = vld [vmem:[%s3458_s6 + $0x7a8] sm:$0xff]  ;;  %v1380_v2 = vld [vmem:[%s3458_s6 + $0x7a0] sm:$0xff] }
 0x326   :  { %1685 = vmatpush.msra.mxu2 %v1366_v45  ;;  %v1379_v45 = vld [vmem:[%s3458_s6 + $0x798] sm:$0xff] }
 0x327   :  { %1578 = vmatpush.msrb.mxu3 %v1293_v61  ;;  %1658 = vmatpush.msra.mxu1 %v1357_v28  ;;  %v1378_v61 = vld [vmem:[%s3458_s6 + $0x790] sm:$0xff]  ;;  %v1377_v28 = vld [vmem:[%s3458_s6 + $0x788] sm:$0xff] }
 0x328   :  { %1686 = vmatpush.msra.mxu2 %v1365_v46  ;;  %v1376_v46 = vld [vmem:[%s3458_s6 + $0x780] sm:$0xff] }
 0x329   :  { %1579 = vmatpush.msrb.mxu3 %v1292_v63  ;;  %1659 = vmatpush.msra.mxu1 %v1356_v49  ;;  %v1840_v49 = vld [vmem:[%s3459_s7] ss:$0 sm:$0xff] }
 0x32a   :  { %1687 = vmatpush.msra.mxu2 %v1364_v59 }
 0x32b   :  { %1580 = vmatpush.msrb.mxu3 %v1291_v48  ;;  %1660 = vmatpush.msra.mxu1 %v1355_v55 }
 0x32c   :  { %1688 = vmatpush.msra.mxu2 %v1363_v11 }
 0x32d   :  { %1581 = vmatpush.msrb.mxu3 %v1290_v53  ;;  %1661 = vmatpush.msra.mxu1 %v1354_v25 }
 0x32e   :  { %1689 = vmatpush.msra.mxu2 %v1362_v54 }
 0x32f   :  { %1582 = vmatpush.msrb.mxu3 %v1289_v50  ;;  %1662 = vmatpush.msra.mxu1 %v1353_v57 }
 0x330   :  { %1690 = vmatpush.msra.mxu2 %v1361_v58 }
 0x331   :  { %1583 = vmatpush.msrb.mxu3 %v1288_v47  ;;  %1663 = vmatpush.msra.mxu1 %v1352_v42 }
 0x332   :  { %1691 = vmatpush.msra.mxu2 %v1360_v56 }
 0x333   :  { %1584 = vmatpush.msrb.mxu3 %v1287_v44  ;;  %1664 = vmatpush.msra.mxu1 %v1351_v27 }
 0x334   :  { %1692 = vmatmul.f32.vlgmr.msra.gmra.mxu2 %v3118_v60  ;;  %v1283_v60 = vld [vmem:[%s3458_s6 + $0x498] sm:$0xff] }
 0x335   :  { %1585 = vmatpush.msrb.mxu3 %v1286_v62  ;;  %1665 = vmatpush.msra.mxu1 %v1350_v0 }
 0x337   :  { %1586 = vmatpush.msrb.mxu3 %v1285_v1  ;;  %1666 = vmatpush.msra.mxu1 %v1349_v3 }
 0x339   :  { %1587 = vmatpush.msrb.mxu3 %v1284_v4  ;;  %1667 = vmatpush.msra.mxu1 %v1348_v37 }
 0x33b   :  { %1588 = vmatpush.msrb.mxu3 %v1283_v60  ;;  %1668 = vmatpush.msra.mxu1 %v1347_v9 }
 0x33d   :  { %1589 = vmatpush.msrb.mxu3 %v1282_v33  ;;  %1669 = vmatpush.msra.mxu1 %v1346_v10 }
 0x33f   :  { %1590 = vmatpush.msrb.mxu3 %v1281_v12  ;;  %1670 = vmatpush.msra.mxu1 %v1345_v30 }
 0x341   :  { %1591 = vmatpush.msrb.mxu3 %v1280_v13  ;;  %1671 = vmatpush.msra.mxu1 %v1344_v16 }
 0x342   :  { %1592 = vmatmul.f32.vlgmr.msrb.gmra.mxu3 %v3042_v26  ;;  %1672 = vmatmul.f32.vlgmr.msra.gmra.mxu1 %v3106_v7  ;;  %v1339_v26 = vld [vmem:[%s3458_s6 + $0x658] sm:$0xff]  ;;  %v1338_v7 = vld [vmem:[%s3458_s6 + $0x650] sm:$0xff] }
 0x343   :  { %1636 = vmatpush.msra.mxu3 %v1343_v17 }
 0x345   :  { %1637 = vmatpush.msra.mxu3 %v1342_v19 }
 0x347   :  { %1638 = vmatpush.msra.mxu3 %v1341_v41 }
 0x349   :  { %1639 = vmatpush.msra.mxu3 %v1340_v20 }
 0x34b   :  { %1640 = vmatpush.msra.mxu3 %v1339_v26 }
 0x34d   :  { %1641 = vmatpush.msra.mxu3 %v1338_v7 }
 0x34f   :  { %1642 = vmatpush.msra.mxu3 %v1337_v21 }
 0x351   :  { %1643 = vmatpush.msra.mxu3 %v1336_v51 }
 0x353   :  { %1644 = vmatpush.msra.mxu3 %v1335_v23 }
 0x355   :  { %1645 = vmatpush.msra.mxu3 %v1334_v24 }
 0x357   :  { %1646 = vmatpush.msra.mxu3 %v1333_v31 }
 0x359   :  { %1647 = vmatpush.msra.mxu3 %v1332_v15 }
 0x35b   :  { %1648 = vmatpush.msra.mxu3 %v1331_v29 }
 0x35d   :  { %1649 = vmatpush.msra.mxu3 %v1330_v18  ;;  %v1433_v55 = vpop.f32.mrf.mxu1 }
 0x35f   :  { %1650 = vmatpush.msra.mxu3 %v1329_v32 }
 0x361   :  { %1651 = vmatpush.msra.mxu3 %v1328_v14 }
 0x362   :  { %1652 = vmatmul.f32.vlgmr.msra.gmra.mxu3 %v3143_v6  ;;  %v1386_v6 = vld [vmem:[%s3458_s6 + $0x7d0] sm:$0xff]  ;;  %s1894_s6 = smov [#allocation4]  }
 0x363   :  { %1696 = vmatpush.msrb.mxu3 %v1391_v34  ;;  %v1413_v63 = vpop.f32.mrf.mxu3  ;;  %s1733_s7 = sshll.u32 %s1894_s6, 4  ;;  %s1734_s7 = int_to_ptr.vmem [resolvable:$true] %s1733_s7 }
 0x364   :  { %v1414_v48 = vadd.f32 %v1840_v49, %v1413_v63 }
 0x365   :  { %1697 = vmatpush.msrb.mxu3 %v1390_v35 }
 0x366   :  { %v1434_v11 = vadd.f32 %v1433_v55, %v1414_v48 }
 0x367   :  { %1698 = vmatpush.msrb.mxu3 %v1389_v36 }
 0x369   :  { %1699 = vmatpush.msrb.mxu3 %v1388_v8 }
 0x36b   :  { %1700 = vmatpush.msrb.mxu3 %v1387_v22  ;;  %v1453_v59 = vpop.f32.mrf.mxu3 }
 0x36d   :  { %1701 = vmatpush.msrb.mxu3 %v1386_v6  ;;  %v1493_v54 = vpop.f32.mrf.mxu1 }
 0x36f   :  { %1702 = vmatpush.msrb.mxu3 %v1385_v38 }
 0x371   :  { %1703 = vmatpush.msrb.mxu3 %v1384_v39 }
 0x373   :  { %1704 = vmatpush.msrb.mxu3 %v1383_v40  ;;  %v1513_v57 = vpop.f32.mrf.mxu2 }
 0x375   :  { %1705 = vmatpush.msrb.mxu3 %v1382_v5 }
 0x377   :  { %1706 = vmatpush.msrb.mxu3 %v1381_v43 }
 0x379   :  { %1707 = vmatpush.msrb.mxu3 %v1380_v2 }
 0x37b   :  { %1708 = vmatpush.msrb.mxu3 %v1379_v45 }
 0x37d   :  { %1709 = vmatpush.msrb.mxu3 %v1378_v61  ;;  %v1573_v27 = vpop.f32.mrf.mxu2 }
 0x37f   :  { %1710 = vmatpush.msrb.mxu3 %v1377_v28  ;;  %v1553_v56 = vpop.f32.mrf.mxu1 }
 0x381   :  { %1711 = vmatpush.msrb.mxu3 %v1376_v46 }
 0x382   :  { %1712 = vmatmul.f32.vlgmr.msrb.gmra.mxu3 %v3131_v52  ;;  %v1454_v52 = vadd.f32 %v1453_v59, %v1434_v11 }
 0x383   :  { %v1473_v53 = vpop.f32.mrf.mxu3 }
 0x384   :  { %v1474_v25 = vadd.f32 %v1473_v53, %v1454_v52 }
 0x386   :  { %v1494_v50 = vadd.f32 %v1493_v54, %v1474_v25 }
 0x388   :  { %v1514_v47 = vadd.f32 %v1513_v57, %v1494_v50 }
 0x395   :  { %v1633_v37 = vpop.f32.mrf.mxu2 }
 0x39f   :  { %v1613_v3 = vpop.f32.mrf.mxu1 }
 0x3a5   :  { %v1533_v58 = vpop.f32.mrf.mxu3 }
 0x3a6   :  { %v1534_v42 = vadd.f32 %v1533_v58, %v1514_v47 }
 0x3a8   :  { %v1554_v44 = vadd.f32 %v1553_v56, %v1534_v42 }
 0x3aa   :  { %v1574_v0 = vadd.f32 %v1573_v27, %v1554_v44 }
 0x3b7   :  { %v1693_v30 = vpop.f32.mrf.mxu2 }
 0x3bf   :  { %v1673_v10 = vpop.f32.mrf.mxu1 }
 0x3c5   :  { %v1593_v62 = vpop.f32.mrf.mxu3 }
 0x3c6   :  { %v1594_v1 = vadd.f32 %v1593_v62, %v1574_v0 }
 0x3c8   :  { %v1614_v4 = vadd.f32 %v1613_v3, %v1594_v1 }
 0x3ca   :  { %v1634_v9 = vadd.f32 %v1633_v37, %v1614_v4 }
 0x3e5   :  { %v1653_v60 = vpop.f32.mrf.mxu3 }
 0x3e6   :  { %v1654_v33 = vadd.f32 %v1653_v60, %v1634_v9 }
 0x3e8   :  { %v1674_v12 = vadd.f32 %v1673_v10, %v1654_v33 }
 0x3ea   :  { %v1694_v13 = vadd.f32 %v1693_v30, %v1674_v12 }
 0x405   :  { %v1713_v16 = vpop.f32.mrf.mxu3 }
 0x406   :  { %v1714_v17 = vadd.f32 %v1713_v16, %v1694_v13 }
 0x408   :  { %1716 = vst [vmem:[#allocation4] sm:$0x3] %v1714_v17 }
 0x409   :  { %1738 = dma.vmem_to_hbm [thread:$0]  %s1734_s7, 32, %s1736_s13, [#allocation5]  }
 0x40a   :  { %1889 = dma.done.wait [#allocation3], 512  }
 0x40b   :  { %1890 = vsyncadd [#allocation3], 4294966784 }
 0x40c   :  { %1891 = dma.done.wait [#allocation5], 32  }
 0x40d   :  { %1892 = vsyncadd [#allocation5], 4294967264 }
 0x40e   :  { %1747 = vsyncpa [#allocation3], 1 }
 0x40f   :  { %1748 = vsyncpa [#allocation5], 1 }

</bundles_post_ra>
